<compile_context>
chip_gen: v5e
topology: v5e:2x2
jax: 0.10.0
libtpu: 0.0.40
codegen_flags: <defaults>
</compile_context>

<pallas_src>
import functools

import jax
import jax.numpy as jnp
from jax import lax
from jax.experimental import pallas as pl
from jax.experimental.pallas import tpu as pltpu

HID = 20    # hidden channel count of the PyTorch module
HIDP = 24   # sublane-aligned (multiple of 8) padded hidden channel count


def _noise_resnet_kernel(hparams, noise_ref,
                         w1_ref, b1_ref, w2_ref, b2_ref,
                         w3_ref, b3_ref, w4_ref, b4_ref,
                         out_ref):
    """One grid step processes `bblk` images folded along the lane axis.

    Layout: channels on sublanes, flattened padded spatial on lanes.
      noise : (ch  , bblk*S2)   with S2 = (nx+2)*(ny+2)
      h1..3 : (HIDP, ...)       HIDP = 24 (zero-padded hidden channels)
      out   : (bblk, ch, NVpad) valid pixels only, lane-dense
    """
    nx, ny, Wp2, S2, bblk, NV, NVpad = hparams
    L = (nx - 1) * Wp2 + ny          # per-image anchor span (incl. garbage cols)
    G = (bblk - 1) * S2 + L          # anchor span over the folded images
    ch = w1_ref.shape[1]

    noise = noise_ref[0]                                        # (ch, bblk*S2)

    # conv1: 1x1 conv == channel matmul, ReLU (pad rows of w1/b1 are zero, so
    # the pad rows of h1 stay exactly zero through the ReLU).
    h1 = jnp.dot(w1_ref[...], noise, preferred_element_type=jnp.float32)
    h1 = jnp.maximum(h1 + b1_ref[...], 0.0)                     # (HIDP, bblk*S2)

    # conv2: 3x3 VALID conv as ONE K = 9*HIDP im2col matmul.  Tap (ki,kj) of
    # anchor g lives at flat position g + ki*Wp2 + kj; taps of valid anchors
    # never leave their own image's padded block, so folding images along the
    # lane axis is safe (garbage anchors are dropped at compaction).  HIDP=24
    # keeps every tap's sublane offset a multiple of 8 (no repacking).
    taps = [h1[:, ki * Wp2 + kj: ki * Wp2 + kj + G]
            for ki in range(3) for kj in range(3)]
    stack = jnp.concatenate(taps, axis=0)                        # (9*HIDP, G)
    h2 = jnp.dot(w2_ref[...], stack, preferred_element_type=jnp.float32)
    h2 = jnp.maximum(h2 + b2_ref[...], 0.0)                      # (HIDP, G)

    # conv3: 1x1 conv, ReLU.
    h3 = jnp.dot(w3_ref[...], h2, preferred_element_type=jnp.float32)
    h3 = jnp.maximum(h3 + b3_ref[...], 0.0)

    # conv4: 1x1 conv + residual (centre tap of anchor g is noise at g+Wp2+1).
    h4 = jnp.dot(w4_ref[...], h3, preferred_element_type=jnp.float32) + b4_ref[...]
    y = h4 + noise[:, Wp2 + 1: Wp2 + 1 + G]                      # (ch, G)

    # On-chip compaction (no selection matmul): row r of image b is the lane
    # slice [b*S2 + r*Wp2, +ny); concatenate the nx rows (plus lane padding to
    # NVpad) and do a single lane-dense store per image.
    pad = [jnp.zeros((ch, NVpad - NV), y.dtype)] if NVpad > NV else []
    for b in range(bblk):
        rows = [y[:, b * S2 + r * Wp2: b * S2 + r * Wp2 + ny] for r in range(nx)]
        out_ref[0, b] = jnp.concatenate(rows + pad, axis=1)      # (ch, NVpad)


def init_params(key, channels):
    """Weights ~ N(0, 0.01), biases zero — matches the module's custom_init.

    Torch-like shapes: w1 (HID, ch), w2 (HID, HID, 3, 3) [OIHW],
    w3 (HID, HID), w4 (ch, HID); biases (Cout,).
    """
    ks = jax.random.split(key, 4)
    w1 = 0.01 * jax.random.normal(ks[0], (HID, channels), jnp.float32)
    w2 = 0.01 * jax.random.normal(ks[1], (HID, HID, 3, 3), jnp.float32)
    w3 = 0.01 * jax.random.normal(ks[2], (HID, HID), jnp.float32)
    w4 = 0.01 * jax.random.normal(ks[3], (channels, HID), jnp.float32)
    b1 = jnp.zeros((HID,), jnp.float32)
    b2 = jnp.zeros((HID,), jnp.float32)
    b3 = jnp.zeros((HID,), jnp.float32)
    b4 = jnp.zeros((channels,), jnp.float32)
    return (w1, b1, w2, b2, w3, b3, w4, b4)


def _default_num_cores():
    """2 TensorCores per chip on v7x, 1 on v5e/v6e; safe fallback of 1."""
    try:
        dev = jax.devices()[0]
        if dev.platform == "tpu" and "7" in str(getattr(dev, "device_kind", "")):
            return 2
    except Exception:
        pass
    return 1


def _auto_batch_block(bs, ch, S2, NVpad, num_cores, budget_bytes=24 << 20):
    """Largest per-step image fold that fits a conservative VMEM budget."""
    # f32 per-step residents per folded image: noise (double-buffered input),
    # h1, the 9-tap stack, h2/h3, h4/y, and the double-buffered output tile.
    per_image = (4 * S2 * (2 * ch + HIDP + 9 * HIDP + 2 * HIDP + 2 * ch)
                 + 2 * 4 * ch * NVpad)
    blk = min(bs, max(1, budget_bytes // max(per_image, 1)))
    if num_cores > 1 and bs >= num_cores:
        # Keep >= num_cores grid steps so every TensorCore gets work (v7x).
        blk = min(blk, -(-bs // num_cores))
    return max(1, blk)


def noise_resnet_forward(x_nchw, params, noise_key, *, batch_block=None,
                         num_cores=None, return_noise=False):
    """Forward pass.  `x_nchw` is used only for its shape (as in PyTorch).

    Returns out (bs, ch, nx, ny); if return_noise also returns the padded
    noise (bs, ch, nx+2, ny+2) in NCHW (validation only).
    """
    bs, ch, nx, ny = x_nchw.shape
    Hp2, Wp2 = nx + 2, ny + 2
    S2 = Hp2 * Wp2
    NV = nx * ny
    NVpad = -(-NV // 128) * 128        # lane-dense (unmasked) output stores

    if num_cores is None:
        num_cores = _default_num_cores()
    if batch_block is None:
        batch_block = _auto_batch_block(bs, ch, S2, NVpad, num_cores)
    batch_block = max(1, min(batch_block, bs))
    num_steps = -(-bs // batch_block)

    # N(0,1) noise, already in the kernel's channel-major lane-flat layout
    # (image b of a step occupies lanes [b*S2, (b+1)*S2), row-major spatial).
    # TODO(synk): generate in-kernel (pltpu.prng_seed + stateful_normal) on
    # TPU-only deployments to remove this HBM stream entirely.
    noise = jax.random.normal(
        noise_key, (num_steps, ch, batch_block * S2), jnp.float32)

    # Kernel-layout weights: (Cout, Cin) matmul form, hidden channels padded
    # with zeros to HIDP=24 so the im2col tap offsets are sublane-aligned.
    w1, b1, w2, b2, w3, b3, w4, b4 = params
    hp = HIDP - HID
    w1k = jnp.pad(w1, ((0, hp), (0, 0)))                           # (HIDP, ch)
    w2k = jnp.pad(jnp.transpose(w2, (0, 2, 3, 1)),                 # (O,kh,kw,I)
                  ((0, hp), (0, 0), (0, 0), (0, hp))).reshape(HIDP, 9 * HIDP)
    w3k = jnp.pad(w3, ((0, hp), (0, hp)))                          # (HIDP, HIDP)
    w4k = jnp.pad(w4, ((0, 0), (0, hp)))                           # (ch, HIDP)
    b1k = jnp.pad(b1, (0, hp)).reshape(HIDP, 1)
    b2k = jnp.pad(b2, (0, hp)).reshape(HIDP, 1)
    b3k = jnp.pad(b3, (0, hp)).reshape(HIDP, 1)
    b4k = b4.reshape(ch, 1)

    def const_spec(a):   # full-array block, constant index_map
        zeros = (0,) * a.ndim
        return pl.BlockSpec(a.shape, lambda s, _z=zeros: _z)

    in_specs = [
        pl.BlockSpec((1, ch, batch_block * S2), lambda s: (s, 0, 0)),  # noise
        const_spec(w1k), const_spec(b1k),
        const_spec(w2k), const_spec(b2k),
        const_spec(w3k), const_spec(b3k),
        const_spec(w4k), const_spec(b4k),
    ]

    kernel = functools.partial(
        _noise_resnet_kernel, (nx, ny, Wp2, S2, batch_block, NV, NVpad))
    out = pl.pallas_call(
        kernel,
        grid=(num_steps,),
        in_specs=in_specs,
        out_specs=pl.BlockSpec((1, batch_block, ch, NVpad),
                               lambda s: (s, 0, 0, 0)),
        out_shape=jax.ShapeDtypeStruct(
            (num_steps, batch_block, ch, NVpad), jnp.float32),
        compiler_params=pltpu.CompilerParams(
            dimension_semantics=("parallel",),
            vmem_limit_bytes=48 * 1024 * 1024),
    )(noise, w1k, b1k, w2k, b2k, w3k, b3k, w4k, b4k)

    out = out[..., :NV].reshape(num_steps * batch_block, ch, nx, ny)[:bs]
    if not return_noise:
        return out
    # Validation-only glue: un-fold the noise back to NCHW padded images.
    noise_nchw = noise.reshape(num_steps, ch, batch_block, Hp2, Wp2)
    noise_nchw = jnp.transpose(noise_nchw, (0, 2, 1, 3, 4))
    noise_nchw = noise_nchw.reshape(num_steps * batch_block, ch, Hp2, Wp2)[:bs]
    return out, noise_nchw


def _reference_forward(noise_nchw, params):
    """Pure-JAX (lax conv) reference on the SAME noise, for validation."""
    w1, b1, w2, b2, w3, b3, w4, b4 = params
    x = jnp.transpose(noise_nchw, (0, 2, 3, 1))                  # NHWC
    dn = ("NHWC", "HWIO", "NHWC")

    def conv(h, w, b):
        if w.ndim == 2:                                          # 1x1: (O, I)
            w_hwio = w.T.reshape(1, 1, w.shape[1], w.shape[0])
        else:                                                    # OIHW -> HWIO
            w_hwio = jnp.transpose(w, (2, 3, 1, 0))
        y = lax.conv_general_dilated(h, w_hwio, (1, 1), "VALID",
                                     dimension_numbers=dn,
                                     precision=lax.Precision.HIGHEST)
        return y + b.reshape(1, 1, 1, -1)

    h = jax.nn.relu(conv(x, w1, b1))
    h = jax.nn.relu(conv(h, w2, b2))
    h = jax.nn.relu(conv(h, w3, b3))
    h = conv(h, w4, b4) + x[:, 1:-1, 1:-1, :]
    return jnp.transpose(h, (0, 3, 1, 2))


if __name__ == "__main__":
    key = jax.random.PRNGKey(0)
    pkey, nkey, xkey = jax.random.split(key, 3)

    bs, ch, nx, ny = 2, 4, 16, 16
    # x's values are never used by the forward pass (only its shape).
    x = jax.random.normal(xkey, (bs, ch, nx, ny), jnp.float32)
    params = init_params(pkey, ch)

    out, noise_nchw = noise_resnet_forward(x, params, nkey, return_noise=True)
    out = jax.block_until_ready(out)

    assert out.shape == (bs, ch, nx, ny), out.shape
    ref = _reference_forward(noise_nchw, params)
    err = float(jnp.max(jnp.abs(out - ref)))
    assert jnp.allclose(out, ref, atol=1e-4, rtol=1e-4), f"max abs err = {err}"

    print("KERNEL_OK")
</pallas_src>

<mosaic_0001>
module attributes {stable_mosaic.version = 11 : i64} {
  func.func @_noise_resnet_kernel(%arg0: i32, %arg1: memref<1x4x648xf32, #tpu.memory_space<vmem>>, %arg2: memref<24x4xf32, #tpu.memory_space<vmem>>, %arg3: memref<24x1xf32, #tpu.memory_space<vmem>>, %arg4: memref<24x216xf32, #tpu.memory_space<vmem>>, %arg5: memref<24x1xf32, #tpu.memory_space<vmem>>, %arg6: memref<24x24xf32, #tpu.memory_space<vmem>>, %arg7: memref<24x1xf32, #tpu.memory_space<vmem>>, %arg8: memref<4x24xf32, #tpu.memory_space<vmem>>, %arg9: memref<4x1xf32, #tpu.memory_space<vmem>>, %arg10: memref<1x2x4x256xf32, #tpu.memory_space<vmem>>) attributes {dimension_semantics = [#tpu.dimension_semantics<parallel>], iteration_bounds = array<i64: 1>, scalar_prefetch = 0 : i64, scratch_operands = 0 : i64, tpu.core_type = #tpu.core_type<tc>, window_params = [{transform_indices = @transform_0, window_bounds = array<i64: 1, 4, 648>}, {pipeline_mode = #tpu.pipeline_mode<synchronous>, transform_indices = @transform_1, window_bounds = array<i64: 24, 4>}, {pipeline_mode = #tpu.pipeline_mode<synchronous>, transform_indices = @transform_2, window_bounds = array<i64: 24, 1>}, {pipeline_mode = #tpu.pipeline_mode<synchronous>, transform_indices = @transform_3, window_bounds = array<i64: 24, 216>}, {pipeline_mode = #tpu.pipeline_mode<synchronous>, transform_indices = @transform_4, window_bounds = array<i64: 24, 1>}, {pipeline_mode = #tpu.pipeline_mode<synchronous>, transform_indices = @transform_5, window_bounds = array<i64: 24, 24>}, {pipeline_mode = #tpu.pipeline_mode<synchronous>, transform_indices = @transform_6, window_bounds = array<i64: 24, 1>}, {pipeline_mode = #tpu.pipeline_mode<synchronous>, transform_indices = @transform_7, window_bounds = array<i64: 4, 24>}, {pipeline_mode = #tpu.pipeline_mode<synchronous>, transform_indices = @transform_8, window_bounds = array<i64: 4, 1>}, {transform_indices = @transform_9, window_bounds = array<i64: 1, 2, 4, 256>}]} {
    %c0 = arith.constant 0 : index
    %c0_0 = arith.constant 0 : index
    %c0_1 = arith.constant 0 : index
    %0 = vector.load %arg1[%c0, %c0_0, %c0_1] : memref<1x4x648xf32, #tpu.memory_space<vmem>>, vector<1x4x648xf32>
    %1 = vector.shape_cast %0 : vector<1x4x648xf32> to vector<4x648xf32>
    %c0_2 = arith.constant 0 : index
    %c0_3 = arith.constant 0 : index
    %2 = vector.load %arg2[%c0_2, %c0_3] : memref<24x4xf32, #tpu.memory_space<vmem>>, vector<24x4xf32>
    %cst = arith.constant dense<0.000000e+00> : vector<24x648xf32>
    %3 = tpu.matmul %2, %1, %cst {dimension_numbers = #tpu.dot_dimension_numbers<[1], [0], [0], [1], [0, 0, 1, 1], [], []>} : vector<24x4xf32>, vector<4x648xf32>, vector<24x648xf32> -> vector<24x648xf32>
    %c0_4 = arith.constant 0 : index
    %c0_5 = arith.constant 0 : index
    %4 = vector.load %arg3[%c0_4, %c0_5] : memref<24x1xf32, #tpu.memory_space<vmem>>, vector<24x1xf32>
    %5 = vector.broadcast %4 : vector<24x1xf32> to vector<24x648xf32>
    %6 = arith.addf %3, %5 : vector<24x648xf32>
    %cst_6 = arith.constant 0.000000e+00 : f32
    %7 = vector.broadcast %cst_6 : f32 to vector<24x648xf32>
    %8 = arith.maximumf %6, %7 : vector<24x648xf32>
    %9 = vector.extract_strided_slice %8 {offsets = [0, 0], sizes = [24, 610], strides = [1, 1]} : vector<24x648xf32> to vector<24x610xf32>
    %10 = vector.extract_strided_slice %8 {offsets = [0, 1], sizes = [24, 610], strides = [1, 1]} : vector<24x648xf32> to vector<24x610xf32>
    %11 = vector.extract_strided_slice %8 {offsets = [0, 2], sizes = [24, 610], strides = [1, 1]} : vector<24x648xf32> to vector<24x610xf32>
    %12 = vector.extract_strided_slice %8 {offsets = [0, 18], sizes = [24, 610], strides = [1, 1]} : vector<24x648xf32> to vector<24x610xf32>
    %13 = vector.extract_strided_slice %8 {offsets = [0, 19], sizes = [24, 610], strides = [1, 1]} : vector<24x648xf32> to vector<24x610xf32>
    %14 = vector.extract_strided_slice %8 {offsets = [0, 20], sizes = [24, 610], strides = [1, 1]} : vector<24x648xf32> to vector<24x610xf32>
    %15 = vector.extract_strided_slice %8 {offsets = [0, 36], sizes = [24, 610], strides = [1, 1]} : vector<24x648xf32> to vector<24x610xf32>
    %16 = vector.extract_strided_slice %8 {offsets = [0, 37], sizes = [24, 610], strides = [1, 1]} : vector<24x648xf32> to vector<24x610xf32>
    %17 = vector.extract_strided_slice %8 {offsets = [0, 38], sizes = [24, 610], strides = [1, 1]} : vector<24x648xf32> to vector<24x610xf32>
    %18 = tpu.concatenate %9, %10, %11, %12, %13, %14, %15, %16, %17 in 0 : vector<24x610xf32>, vector<24x610xf32>, vector<24x610xf32>, vector<24x610xf32>, vector<24x610xf32>, vector<24x610xf32>, vector<24x610xf32>, vector<24x610xf32>, vector<24x610xf32> -> vector<216x610xf32>
    %c0_7 = arith.constant 0 : index
    %c0_8 = arith.constant 0 : index
    %19 = vector.load %arg4[%c0_7, %c0_8] : memref<24x216xf32, #tpu.memory_space<vmem>>, vector<24x216xf32>
    %cst_9 = arith.constant dense<0.000000e+00> : vector<24x610xf32>
    %20 = tpu.matmul %19, %18, %cst_9 {dimension_numbers = #tpu.dot_dimension_numbers<[1], [0], [0], [1], [0, 0, 1, 1], [], []>} : vector<24x216xf32>, vector<216x610xf32>, vector<24x610xf32> -> vector<24x610xf32>
    %c0_10 = arith.constant 0 : index
    %c0_11 = arith.constant 0 : index
    %21 = vector.load %arg5[%c0_10, %c0_11] : memref<24x1xf32, #tpu.memory_space<vmem>>, vector<24x1xf32>
    %22 = vector.broadcast %21 : vector<24x1xf32> to vector<24x610xf32>
    %23 = arith.addf %20, %22 : vector<24x610xf32>
    %cst_12 = arith.constant 0.000000e+00 : f32
    %24 = vector.broadcast %cst_12 : f32 to vector<24x610xf32>
    %25 = arith.maximumf %23, %24 : vector<24x610xf32>
    %c0_13 = arith.constant 0 : index
    %c0_14 = arith.constant 0 : index
    %26 = vector.load %arg6[%c0_13, %c0_14] : memref<24x24xf32, #tpu.memory_space<vmem>>, vector<24x24xf32>
    %cst_15 = arith.constant dense<0.000000e+00> : vector<24x610xf32>
    %27 = tpu.matmul %26, %25, %cst_15 {dimension_numbers = #tpu.dot_dimension_numbers<[1], [0], [0], [1], [0, 0, 1, 1], [], []>} : vector<24x24xf32>, vector<24x610xf32>, vector<24x610xf32> -> vector<24x610xf32>
    %c0_16 = arith.constant 0 : index
    %c0_17 = arith.constant 0 : index
    %28 = vector.load %arg7[%c0_16, %c0_17] : memref<24x1xf32, #tpu.memory_space<vmem>>, vector<24x1xf32>
    %29 = vector.broadcast %28 : vector<24x1xf32> to vector<24x610xf32>
    %30 = arith.addf %27, %29 : vector<24x610xf32>
    %cst_18 = arith.constant 0.000000e+00 : f32
    %31 = vector.broadcast %cst_18 : f32 to vector<24x610xf32>
    %32 = arith.maximumf %30, %31 : vector<24x610xf32>
    %c0_19 = arith.constant 0 : index
    %c0_20 = arith.constant 0 : index
    %33 = vector.load %arg8[%c0_19, %c0_20] : memref<4x24xf32, #tpu.memory_space<vmem>>, vector<4x24xf32>
    %cst_21 = arith.constant dense<0.000000e+00> : vector<4x610xf32>
    %34 = tpu.matmul %33, %32, %cst_21 {dimension_numbers = #tpu.dot_dimension_numbers<[1], [0], [0], [1], [0, 0, 1, 1], [], []>} : vector<4x24xf32>, vector<24x610xf32>, vector<4x610xf32> -> vector<4x610xf32>
    %c0_22 = arith.constant 0 : index
    %c0_23 = arith.constant 0 : index
    %35 = vector.load %arg9[%c0_22, %c0_23] : memref<4x1xf32, #tpu.memory_space<vmem>>, vector<4x1xf32>
    %36 = vector.broadcast %35 : vector<4x1xf32> to vector<4x610xf32>
    %37 = arith.addf %34, %36 : vector<4x610xf32>
    %38 = vector.extract_strided_slice %1 {offsets = [0, 19], sizes = [4, 610], strides = [1, 1]} : vector<4x648xf32> to vector<4x610xf32>
    %39 = arith.addf %37, %38 : vector<4x610xf32>
    %40 = vector.extract_strided_slice %39 {offsets = [0, 0], sizes = [4, 16], strides = [1, 1]} : vector<4x610xf32> to vector<4x16xf32>
    %41 = vector.extract_strided_slice %39 {offsets = [0, 18], sizes = [4, 16], strides = [1, 1]} : vector<4x610xf32> to vector<4x16xf32>
    %42 = vector.extract_strided_slice %39 {offsets = [0, 36], sizes = [4, 16], strides = [1, 1]} : vector<4x610xf32> to vector<4x16xf32>
    %43 = vector.extract_strided_slice %39 {offsets = [0, 54], sizes = [4, 16], strides = [1, 1]} : vector<4x610xf32> to vector<4x16xf32>
    %44 = vector.extract_strided_slice %39 {offsets = [0, 72], sizes = [4, 16], strides = [1, 1]} : vector<4x610xf32> to vector<4x16xf32>
    %45 = vector.extract_strided_slice %39 {offsets = [0, 90], sizes = [4, 16], strides = [1, 1]} : vector<4x610xf32> to vector<4x16xf32>
    %46 = vector.extract_strided_slice %39 {offsets = [0, 108], sizes = [4, 16], strides = [1, 1]} : vector<4x610xf32> to vector<4x16xf32>
    %47 = vector.extract_strided_slice %39 {offsets = [0, 126], sizes = [4, 16], strides = [1, 1]} : vector<4x610xf32> to vector<4x16xf32>
    %48 = vector.extract_strided_slice %39 {offsets = [0, 144], sizes = [4, 16], strides = [1, 1]} : vector<4x610xf32> to vector<4x16xf32>
    %49 = vector.extract_strided_slice %39 {offsets = [0, 162], sizes = [4, 16], strides = [1, 1]} : vector<4x610xf32> to vector<4x16xf32>
    %50 = vector.extract_strided_slice %39 {offsets = [0, 180], sizes = [4, 16], strides = [1, 1]} : vector<4x610xf32> to vector<4x16xf32>
    %51 = vector.extract_strided_slice %39 {offsets = [0, 198], sizes = [4, 16], strides = [1, 1]} : vector<4x610xf32> to vector<4x16xf32>
    %52 = vector.extract_strided_slice %39 {offsets = [0, 216], sizes = [4, 16], strides = [1, 1]} : vector<4x610xf32> to vector<4x16xf32>
    %53 = vector.extract_strided_slice %39 {offsets = [0, 234], sizes = [4, 16], strides = [1, 1]} : vector<4x610xf32> to vector<4x16xf32>
    %54 = vector.extract_strided_slice %39 {offsets = [0, 252], sizes = [4, 16], strides = [1, 1]} : vector<4x610xf32> to vector<4x16xf32>
    %55 = vector.extract_strided_slice %39 {offsets = [0, 270], sizes = [4, 16], strides = [1, 1]} : vector<4x610xf32> to vector<4x16xf32>
    %56 = tpu.concatenate %40, %41, %42, %43, %44, %45, %46, %47, %48, %49, %50, %51, %52, %53, %54, %55 in 1 : vector<4x16xf32>, vector<4x16xf32>, vector<4x16xf32>, vector<4x16xf32>, vector<4x16xf32>, vector<4x16xf32>, vector<4x16xf32>, vector<4x16xf32>, vector<4x16xf32>, vector<4x16xf32>, vector<4x16xf32>, vector<4x16xf32>, vector<4x16xf32>, vector<4x16xf32>, vector<4x16xf32>, vector<4x16xf32> -> vector<4x256xf32>
    %c0_24 = arith.constant 0 : index
    %c0_25 = arith.constant 0 : index
    %c0_26 = arith.constant 0 : index
    %c0_27 = arith.constant 0 : index
    %57 = vector.load %arg10[%c0_24, %c0_25, %c0_26, %c0_27] : memref<1x2x4x256xf32, #tpu.memory_space<vmem>>, vector<1x1x4x256xf32>
    %58 = vector.shape_cast %57 : vector<1x1x4x256xf32> to vector<4x256xf32>
    %59 = vector.shape_cast %56 : vector<4x256xf32> to vector<1x1x4x256xf32>
    tpu.vector_store %arg10[%c0_24, %c0_25, %c0_26, %c0_27], %59 {strides = array<i32>} : memref<1x2x4x256xf32, #tpu.memory_space<vmem>>, vector<1x1x4x256xf32>,
    %60 = vector.extract_strided_slice %39 {offsets = [0, 324], sizes = [4, 16], strides = [1, 1]} : vector<4x610xf32> to vector<4x16xf32>
    %61 = vector.extract_strided_slice %39 {offsets = [0, 342], sizes = [4, 16], strides = [1, 1]} : vector<4x610xf32> to vector<4x16xf32>
    %62 = vector.extract_strided_slice %39 {offsets = [0, 360], sizes = [4, 16], strides = [1, 1]} : vector<4x610xf32> to vector<4x16xf32>
    %63 = vector.extract_strided_slice %39 {offsets = [0, 378], sizes = [4, 16], strides = [1, 1]} : vector<4x610xf32> to vector<4x16xf32>
    %64 = vector.extract_strided_slice %39 {offsets = [0, 396], sizes = [4, 16], strides = [1, 1]} : vector<4x610xf32> to vector<4x16xf32>
    %65 = vector.extract_strided_slice %39 {offsets = [0, 414], sizes = [4, 16], strides = [1, 1]} : vector<4x610xf32> to vector<4x16xf32>
    %66 = vector.extract_strided_slice %39 {offsets = [0, 432], sizes = [4, 16], strides = [1, 1]} : vector<4x610xf32> to vector<4x16xf32>
    %67 = vector.extract_strided_slice %39 {offsets = [0, 450], sizes = [4, 16], strides = [1, 1]} : vector<4x610xf32> to vector<4x16xf32>
    %68 = vector.extract_strided_slice %39 {offsets = [0, 468], sizes = [4, 16], strides = [1, 1]} : vector<4x610xf32> to vector<4x16xf32>
    %69 = vector.extract_strided_slice %39 {offsets = [0, 486], sizes = [4, 16], strides = [1, 1]} : vector<4x610xf32> to vector<4x16xf32>
    %70 = vector.extract_strided_slice %39 {offsets = [0, 504], sizes = [4, 16], strides = [1, 1]} : vector<4x610xf32> to vector<4x16xf32>
    %71 = vector.extract_strided_slice %39 {offsets = [0, 522], sizes = [4, 16], strides = [1, 1]} : vector<4x610xf32> to vector<4x16xf32>
    %72 = vector.extract_strided_slice %39 {offsets = [0, 540], sizes = [4, 16], strides = [1, 1]} : vector<4x610xf32> to vector<4x16xf32>
    %73 = vector.extract_strided_slice %39 {offsets = [0, 558], sizes = [4, 16], strides = [1, 1]} : vector<4x610xf32> to vector<4x16xf32>
    %74 = vector.extract_strided_slice %39 {offsets = [0, 576], sizes = [4, 16], strides = [1, 1]} : vector<4x610xf32> to vector<4x16xf32>
    %75 = vector.extract_strided_slice %39 {offsets = [0, 594], sizes = [4, 16], strides = [1, 1]} : vector<4x610xf32> to vector<4x16xf32>
    %76 = tpu.concatenate %60, %61, %62, %63, %64, %65, %66, %67, %68, %69, %70, %71, %72, %73, %74, %75 in 1 : vector<4x16xf32>, vector<4x16xf32>, vector<4x16xf32>, vector<4x16xf32>, vector<4x16xf32>, vector<4x16xf32>, vector<4x16xf32>, vector<4x16xf32>, vector<4x16xf32>, vector<4x16xf32>, vector<4x16xf32>, vector<4x16xf32>, vector<4x16xf32>, vector<4x16xf32>, vector<4x16xf32>, vector<4x16xf32> -> vector<4x256xf32>
    %c0_28 = arith.constant 0 : index
    %c1 = arith.constant 1 : index
    %c0_29 = arith.constant 0 : index
    %c0_30 = arith.constant 0 : index
    %77 = vector.load %arg10[%c0_28, %c1, %c0_29, %c0_30] : memref<1x2x4x256xf32, #tpu.memory_space<vmem>>, vector<1x1x4x256xf32>
    %78 = vector.shape_cast %77 : vector<1x1x4x256xf32> to vector<4x256xf32>
    %79 = vector.shape_cast %76 : vector<4x256xf32> to vector<1x1x4x256xf32>
    tpu.vector_store %arg10[%c0_28, %c1, %c0_29, %c0_30], %79 {strides = array<i32>} : memref<1x2x4x256xf32, #tpu.memory_space<vmem>>, vector<1x1x4x256xf32>,
    return
  }
  func.func @transform_0(%arg0: i32) -> (i32, i32, i32) {
    %c0_i32 = arith.constant 0 : i32
    %c0_i32_0 = arith.constant 0 : i32
    %c0_i32_1 = arith.constant 0 : i32
    return %arg0, %c0_i32, %c0_i32_0 : i32, i32, i32
  }
  func.func @transform_1(%arg0: i32) -> (i32, i32) {
    %c0_i32 = arith.constant 0 : i32
    %c0_i32_0 = arith.constant 0 : i32
    %c0_i32_1 = arith.constant 0 : i32
    return %c0_i32, %c0_i32_0 : i32, i32
  }
  func.func @transform_2(%arg0: i32) -> (i32, i32) {
    %c0_i32 = arith.constant 0 : i32
    %c0_i32_0 = arith.constant 0 : i32
    %c0_i32_1 = arith.constant 0 : i32
    return %c0_i32, %c0_i32_0 : i32, i32
  }
  func.func @transform_3(%arg0: i32) -> (i32, i32) {
    %c0_i32 = arith.constant 0 : i32
    %c0_i32_0 = arith.constant 0 : i32
    %c0_i32_1 = arith.constant 0 : i32
    return %c0_i32, %c0_i32_0 : i32, i32
  }
  func.func @transform_4(%arg0: i32) -> (i32, i32) {
    %c0_i32 = arith.constant 0 : i32
    %c0_i32_0 = arith.constant 0 : i32
    %c0_i32_1 = arith.constant 0 : i32
    return %c0_i32, %c0_i32_0 : i32, i32
  }
  func.func @transform_5(%arg0: i32) -> (i32, i32) {
    %c0_i32 = arith.constant 0 : i32
    %c0_i32_0 = arith.constant 0 : i32
    %c0_i32_1 = arith.constant 0 : i32
    return %c0_i32, %c0_i32_0 : i32, i32
  }
  func.func @transform_6(%arg0: i32) -> (i32, i32) {
    %c0_i32 = arith.constant 0 : i32
    %c0_i32_0 = arith.constant 0 : i32
    %c0_i32_1 = arith.constant 0 : i32
    return %c0_i32, %c0_i32_0 : i32, i32
  }
  func.func @transform_7(%arg0: i32) -> (i32, i32) {
    %c0_i32 = arith.constant 0 : i32
    %c0_i32_0 = arith.constant 0 : i32
    %c0_i32_1 = arith.constant 0 : i32
    return %c0_i32, %c0_i32_0 : i32, i32
  }
  func.func @transform_8(%arg0: i32) -> (i32, i32) {
    %c0_i32 = arith.constant 0 : i32
    %c0_i32_0 = arith.constant 0 : i32
    %c0_i32_1 = arith.constant 0 : i32
    return %c0_i32, %c0_i32_0 : i32, i32
  }
  func.func @transform_9(%arg0: i32) -> (i32, i32, i32, i32) {
    %c0_i32 = arith.constant 0 : i32
    %c0_i32_0 = arith.constant 0 : i32
    %c0_i32_1 = arith.constant 0 : i32
    %c0_i32_2 = arith.constant 0 : i32
    return %arg0, %c0_i32, %c0_i32_0, %c0_i32_1 : i32, i32, i32, i32
  }
}

</mosaic_0001>

<bundles_post_ra>
// kernel: tpu_custom_call.1
= control target key start
LH: loop header
LB: loop body
LE: loop exit
PB: predicated region body
PF: predicated region fallthrough
CT: control target
= control target key end

     0   :  { %v2024_v2 = vmov 0   ;;  %s3122_s0 = inlined_call_operand.vmem [shape: f32[1,4,648], index: 0, kind: input, shape index: {}]   ;;  %s3123_s1 = inlined_call_operand.vmem [shape: f32[24,4], index: 1, kind: input, shape index: {}]   ;;  %s3124_s2 = inlined_call_operand.vmem [shape: f32[24,1], index: 2, kind: input, shape index: {}]   ;;  %s3125_s3 = inlined_call_operand.vmem [shape: f32[24,216], index: 3, kind: input, shape index: {}]   ;;  %s3126_s4 = inlined_call_operand.vmem [shape: f32[24,1], index: 4, kind: input, shape index: {}]   ;;  %s3127_s5 = inlined_call_operand.vmem [shape: f32[24,24], index: 5, kind: input, shape index: {}]   ;;  %s3128_s6 = inlined_call_operand.vmem [shape: f32[24,1], index: 6, kind: input, shape index: {}]   ;;  %s3129_s7 = inlined_call_operand.vmem [shape: f32[4,24], index: 7, kind: input, shape index: {}]   ;;  %s3130_s8 = inlined_call_operand.vmem [shape: f32[4,1], index: 8, kind: input, shape index: {}]   ;;  %s3131_s9 = inlined_call_operand.hbm [shape: f32[1,2,4,256], index: 9, kind: output, shape index: {}]  }
   0x1   :  { %v33_v0 = vld [vmem:[%s3122_s0] sm:$0xff]  ;;  %v34_v1 = vld [vmem:[%s3122_s0 + $0x8] sm:$0xff]  ;;  %1685 = vset.pattern.permute.xlu0 %v2024_v2  ;;  %1686 = vset.pattern.permute.xlu1 %v2024_v2  ;;  %v35_v5 = vld [vmem:[%s3122_s0 + $0x10] sm:$0xff] }
   0x2   :  { %60 = vst [vmem:[#allocation1] ss:$2 sm:$0xff] %v33_v0  ;;  %v39_v3 = vld [vmem:[%s3124_s2] sm:$0xff]  ;;  %v40_v4 = vld [vmem:[%s3124_s2 + $0x8] sm:$0xff]  ;;  %1997 = vset.pattern.permute.xlu2 %v2024_v2 }
   0x3   :  { %62 = vst [vmem:[#allocation1 + $0x10] ss:$2 sm:$0xff] %v34_v1  ;;  %44 = vperm.xlu0 %1685, %v39_v3   ;;  %49 = vperm.xlu1 %1686, %v40_v4  }
   0x4   :  { %64 = vst [vmem:[#allocation1 + $0x20] ss:$2 sm:$0xff] %v35_v5 }
   0x5   :  { %14 = vsyncpa [#allocation3], 0  ;;  %vm81_vm0 = vcmask 1043456   ;;  %v36_v6 = vld [vmem:[%s3123_s1] sm:$0xff]  ;;  %vm71_vm1 = vcmask 31744   ;;  %v41_v10 = vld [vmem:[%s3124_s2 + $0x10] sm:$0xff] }
   0x6   :  { %v37_v14 = vld [vmem:[%s3123_s1 + $0x8] sm:$0xff]  ;;  %v38_v15 = vld [vmem:[%s3123_s1 + $0x10] sm:$0xff]  ;;  %s2025_s1 = smov 90   ;;  %s2026_s25 = smov 109   ;;  %vm545_vm2 = vcmask 883712   ;;  %vm487_vm3 = vcmask 891904  }
   0x7   :  { %s2027_s26 = smov 108   ;;  %s2028_s27 = smov 91   ;;  %vm429_vm4 = vcmask 900096   ;;  %vm371_vm5 = vcmask 1031168   ;;  %vm746_vm6 = vcmask 736256   ;;  %vm612_vm7 = vcmask 752640  }
   0x8   :  { %s2029_s28 = smov 110   ;;  %s2030_s29 = smov 126   ;;  %vm679_vm8 = vcmask 744448   ;;  %vm313_vm9 = vcmask 1039360   ;;  %vm801_vm10 = vcmask 719872   ;;  %vm1107_vm11 = vcmask 195584  }
   0x9   :  { %v65_v7 = vld.sshfl [vmem:[#allocation1] sm:$0xff pattern:$0x75316420]  ;;  %v66_v8 = vld.sshfl [vmem:[#allocation1 + $0x8] sm:$0xff pattern:$0x75316420] }
   0xa   :  { %1586 = vmatpush.msk.msra.mxu0 %vm81_vm0, %v65_v7  ;;  %1590 = vmatpush.msk.msra.mxu1 %vm81_vm0, %v66_v8  ;;  %1372 = vst [vmem:[#allocation1] ss:$2 sm:$0xff] %v33_v0  ;;  %v67_v9 = vld.sshfl [vmem:[#allocation1 + $0x10] sm:$0xff pattern:$0x75316420]  ;;  %s2031_s30 = smov 92  }
   0xb   :  { %1594 = vmatpush.msk.msra.mxu2 %vm81_vm0, %v67_v9  ;;  %v68_v11 = vld.sshfl [vmem:[#allocation1 + $0x18] sm:$0xff pattern:$0x75316420]  ;;  %1587 = vmatmul.msk.f32.vlgmr.msra.gmra.mxu0 %vm71_vm1, %v36_v6  ;;  %v69_v12 = vld.sshfl [vmem:[#allocation1 + $0x20] sm:$0xff pattern:$0x75316420] }
   0xc   :  { %1598 = vmatpush.msk.msra.mxu3 %vm81_vm0, %v68_v11  ;;  %1374 = vst [vmem:[#allocation1 + $0x10] ss:$2 sm:$0xff] %v34_v1  ;;  %1591 = vmatmul.msk.f32.vlgmr.msra.gmra.mxu1 %vm71_vm1, %v36_v6  ;;  %v70_v13 = vld.sshfl [vmem:[#allocation1 + $0x28] sm:$0xff pattern:$0x75316420]  ;;  %s2032_s10 = smov 127  }
   0xd   :  { %1595 = vmatmul.msk.f32.vlgmr.msra.gmra.mxu2 %vm71_vm1, %v36_v6  ;;  %1599 = vmatmul.msk.f32.vlgmr.msra.gmra.mxu3 %vm71_vm1, %v36_v6  ;;  %1376 = vst [vmem:[#allocation1 + $0x20] ss:$2 sm:$0xff] %v35_v5  ;;  %s2035_s20 = smov 116   ;;  %s2037_s21 = smov 120   ;;  %vm1462_vm12 = vcmask 130048   ;;  %vm1464_vm13 = vcmask 261120  }
   0xe   :  { %54 = vperm.xlu0 %1685, %v41_v10   ;;  %1602 = vmatpush.msk.msrb.mxu0 %vm81_vm0, %v69_v12  ;;  %s2038_s0 = smov 114   ;;  %s2040_s2 = smov 106   ;;  %vm1466_vm14 = vcmask 392192   ;;  %vm1468_vm15 = vcmask 523264  }
   0xf   :  { %1606 = vmatpush.msk.msrb.mxu1 %vm81_vm0, %v70_v13  ;;  %s2041_s22 = smov 104   ;;  %s2042_s23 = smov 100  }
  0x10   :  { %s2043_s24 = smov 102   ;;  %s2050_s11 = smov 44  }
  0x11   :  { %s2052_s12 = smov 50   ;;  %s2054_s13 = smov 52  }
  0x12   :  { %s2056_s14 = smov 38   ;;  %s2057_s15 = smov 34  }
  0x13   :  { %1588 = vmatmul.msk.f32.gmra.mxu0 %vm71_vm1, %v37_v14  ;;  %s2058_s16 = smov 48   ;;  %s2059_s17 = smov 30  }
  0x14   :  { %1592 = vmatmul.msk.f32.gmra.mxu1 %vm71_vm1, %v37_v14  ;;  %s2060_s18 = smov 46  }
  0x15   :  { %1596 = vmatmul.msk.f32.gmra.mxu2 %vm71_vm1, %v37_v14  ;;  %1600 = vmatmul.msk.f32.gmra.mxu3 %vm71_vm1, %v37_v14 }
  0x1b   :  { %1589 = vmatmul.msk.f32.gmra.mxu0 %vm71_vm1, %v38_v15 }
  0x1c   :  { %1593 = vmatmul.msk.f32.gmra.mxu1 %vm71_vm1, %v38_v15 }
  0x1d   :  { %1597 = vmatmul.msk.f32.gmra.mxu2 %vm71_vm1, %v38_v15  ;;  %1601 = vmatmul.msk.f32.gmra.mxu3 %vm71_vm1, %v38_v15 }
  0x23   :  { %1603 = vmatmul.msk.f32.vlgmr.msrb.gmra.mxu0 %vm71_vm1, %v36_v6 }
  0x24   :  { %1607 = vmatmul.msk.f32.vlgmr.msrb.gmra.mxu1 %vm71_vm1, %v36_v6 }
  0x2b   :  { %1604 = vmatmul.msk.f32.gmra.mxu0 %vm71_vm1, %v37_v14 }
  0x2c   :  { %1608 = vmatmul.msk.f32.gmra.mxu1 %vm71_vm1, %v37_v14 }
  0x33   :  { %1605 = vmatmul.msk.f32.gmra.mxu0 %vm71_vm1, %v38_v15 }
  0x34   :  { %1609 = vmatmul.msk.f32.gmra.mxu1 %vm71_vm1, %v38_v15  ;;  %vm1470_vm1 = vcmask 654336  }
  0x75   :  { %v2165_v16 = vpop.permute.xlu0 %44  ;;  %v2179_v24 = vpop.permute.xlu1 %49 }
  0x80   :  { %v2225_v48 = vpop.permute.xlu0 %54 }
  0x88   :  { %v111_v17 = vpop.f32.mrf.mxu0 }
  0x89   :  { %v2168_v18 = vadd.f32 %v111_v17, %v2165_v16  ;;  %v137_v19 = vpop.f32.mrf.mxu1 }
  0x8a   :  { %v2171_v20 = vadd.f32 %v137_v19, %v2165_v16 }
  0x8b   :  { %v3142_v21 = vmax.f32 %v2168_v18, 0.0 }
  0x8c   :  { %v3135_v22 = vmax.f32 %v2171_v20, 0.0 }
  0x8e   :  { %v1702_v23 = vpack.i.bf16 %v3135_v22, %v3142_v21 }
  0x90   :  { %1703 = vrot.lane.b32.xlu2 %v1702_v23, %s2025_s1  ;;  %1693 = vrot.lane.b32.xlu0 %v1702_v23, %s2026_s25  ;;  %v114_v25 = vpop.f32.mrf.mxu0  ;;  %v163_v27 = vpop.f32.mrf.mxu2 }
  0x91   :  { %1688 = vrot.lane.b32.xlu1 %v1702_v23, %s2027_s26  ;;  %v140_v26 = vpop.f32.mrf.mxu1  ;;  %v189_v28 = vpop.f32.mrf.mxu3  ;;  %v2185_v29 = vadd.f32 %v114_v25, %v2179_v24  ;;  %v2200_v36 = vadd.f32 %v163_v27, %v2165_v16 }
  0x92   :  { %v2188_v30 = vadd.f32 %v140_v26, %v2179_v24  ;;  %v2203_v37 = vadd.f32 %v189_v28, %v2165_v16 }
  0x93   :  { %v3144_v31 = vmax.f32 %v2185_v29, 0.0  ;;  %v3134_v40 = vmax.f32 %v2200_v36, 0.0 }
  0x94   :  { %v3136_v32 = vmax.f32 %v2188_v30, 0.0  ;;  %3176 = vst [vmem:[#allocation5_spill] sm:$0xff] %v2203_v37  ;;  %v3132_v41 = vmax.f32 %v2203_v37, 0.0 }
  0x96   :  { %v1782_v33 = vpack.i.bf16 %v3136_v32, %v3144_v31  ;;  %v1727_v44 = vpack.i.bf16 %v3132_v41, %v3134_v40 }
  0x98   :  { %1713 = vrot.lane.b32.xlu2 %v1702_v23, %s2028_s27  ;;  %1698 = vrot.lane.b32.xlu0 %v1702_v23, %s2029_s28  ;;  %v166_v34 = vpop.f32.mrf.mxu2  ;;  %v117_v46 = vpop.f32.mrf.mxu0 }
  0x99   :  { %1783 = vrot.lane.b32.xlu1 %v1782_v33, %s2030_s29  ;;  %v192_v35 = vpop.f32.mrf.mxu3  ;;  %v167_v38 = vadd.f32 %v166_v34, %v2179_v24  ;;  %v143_v47 = vpop.f32.mrf.mxu1  ;;  %v2228_v49 = vadd.f32 %v117_v46, %v2225_v48 }
  0x9a   :  { %v193_v39 = vadd.f32 %v192_v35, %v2179_v24  ;;  %v2231_v50 = vadd.f32 %v143_v47, %v2225_v48 }
  0x9b   :  { %v2212_v42 = vmax.f32 %v167_v38, 0.0  ;;  %v3145_v51 = vmax.f32 %v2228_v49, 0.0 }
  0x9c   :  { %v2214_v43 = vmax.f32 %v193_v39, 0.0  ;;  %v3138_v52 = vmax.f32 %v2231_v50, 0.0 }
  0x9e   :  { %3177 = vst [vmem:[#allocation6_spill] sm:$0xff] %v2214_v43  ;;  %v1817_v45 = vpack.i.bf16 %v2214_v43, %v2212_v42  ;;  %v1847_v53 = vpack.i.bf16 %v3138_v52, %v3145_v51 }
  0xa0   :  { %1723 = vrot.lane.b32.xlu2 %v1702_v23, %s2031_s30  ;;  %1708 = vrot.lane.b32.xlu0 %v1702_v23, %s2030_s29  ;;  %v169_v54 = vpop.f32.mrf.mxu2  ;;  %v215_v63 = vpop.f32.mrf.mxu0 }
  0xa1   :  { %1793 = vrot.lane.b32.xlu1 %v1782_v33, %s2032_s10  ;;  %v195_v55 = vpop.f32.mrf.mxu3  ;;  %v170_v56 = vadd.f32 %v169_v54, %v2225_v48  ;;  %v216_v0 = vadd.f32 %v215_v63, %v2165_v16  ;;  %v241_v4 = vpop.f32.mrf.mxu1 }
  0xa2   :  { %v196_v57 = vadd.f32 %v195_v55, %v2225_v48  ;;  %v242_v55 = vadd.f32 %v241_v4, %v2165_v16 }
  0xa3   :  { %v2259_v58 = vmax.f32 %v170_v56, 0.0  ;;  %v2291_v2 = vmax.f32 %v216_v0, 0.0 }
  0xa4   :  { %v2261_v59 = vmax.f32 %v196_v57, 0.0  ;;  %v255_v63 = vmax.f32 %v242_v55, 0.0 }
  0xa5   :  { %3179 = vst [vmem:[#allocation8_spill] sm:$0xff] %v2291_v2  ;;  %v1922_v3 = vpack.i.bf16 %v2259_v58, %v2291_v2 }
  0xa6   :  { %3178 = vst [vmem:[#allocation7_spill] sm:$0xff] %v2261_v59  ;;  %v2265_v60 = vpack.i.bf16 %v2261_v59, %v2259_v58  ;;  %v1917_v15 = vpack.i.bf16 %v2212_v42, %v2261_v59 }
  0xa8   :  { %1728 = vrot.lane.b32.xlu2 %v1727_v44, %s2027_s26  ;;  %1718 = vrot.lane.b32.xlu0 %v1702_v23, %s2032_s10  ;;  %v218_v17 = vpop.f32.mrf.mxu0 }
  0xa9   :  { %1818 = vrot.lane.b32.xlu1 %v1817_v45, %s2025_s1  ;;  %v244_v25 = vpop.f32.mrf.mxu1  ;;  %v219_v34 = vadd.f32 %v218_v17, %v2179_v24 }
  0xaa   :  { %v245_v35 = vadd.f32 %v244_v25, %v2179_v24 }
  0xab   :  { %v2341_v38 = vmax.f32 %v219_v34, 0.0 }
  0xac   :  { %v261_v39 = vmax.f32 %v245_v35, 0.0 }
  0xad   :  { %3180 = vst [vmem:[#allocation9_spill] sm:$0xff] %v2341_v38 }
  0xae   :  { %v1937_v57 = vpack.i.bf16 %v261_v39, %v2341_v38 }
  0xb0   :  { %1733 = vrot.lane.b32.xlu2 %v1727_v44, %s2026_s25  ;;  %1743 = vrot.lane.b32.xlu0 %v1727_v44, %s2025_s1  ;;  %v221_v46 = vpop.f32.mrf.mxu0 }
  0xb1   :  { %1828 = vrot.lane.b32.xlu1 %v1817_v45, %s2028_s27  ;;  %v222_v56 = vadd.f32 %v221_v46, %v2225_v48 }
  0xb3   :  { %v2365_v0 = vmax.f32 %v222_v56, 0.0 }
  0xb8   :  { %1738 = vrot.lane.b32.xlu2 %v1727_v44, %s2029_s28  ;;  %1753 = vrot.lane.b32.xlu0 %v1727_v44, %s2028_s27 }
  0xb9   :  { %1848 = vrot.lane.b32.xlu1 %v1847_v53, %s2029_s28 }
  0xc0   :  { %1748 = vrot.lane.b32.xlu2 %v1727_v44, %s2030_s29  ;;  %1758 = vrot.lane.b32.xlu0 %v1727_v44, %s2032_s10 }
  0xc1   :  { %1853 = vrot.lane.b32.xlu1 %v1847_v53, %s2025_s1 }
  0xc8   :  { %1763 = vrot.lane.b32.xlu2 %v1727_v44, %s2031_s30  ;;  %1778 = vrot.lane.b32.xlu0 %v1782_v33, %s2025_s1 }
  0xc9   :  { %1863 = vrot.lane.b32.xlu1 %v1847_v53, %s2028_s27 }
  0xd0   :  { %1768 = vrot.lane.b32.xlu2 %v1782_v33, %s2026_s25  ;;  %1788 = vrot.lane.b32.xlu0 %v1782_v33, %s2028_s27 }
  0xd1   :  { %1873 = vrot.lane.b32.xlu1 %v1847_v53, %s2031_s30 }
  0xd8   :  { %1773 = vrot.lane.b32.xlu2 %v1782_v33, %s2029_s28  ;;  %1798 = vrot.lane.b32.xlu0 %v1782_v33, %s2031_s30 }
  0xd9   :  { %1878 = vrot.lane.b32.xlu1 %v1847_v53, %s2027_s26 }
  0xe0   :  { %1838 = vrot.lane.b32.xlu2 %v1817_v45, %s2031_s30  ;;  %1803 = vrot.lane.b32.xlu0 %v1782_v33, %s2027_s26 }
  0xe1   :  { %1883 = vrot.lane.b32.xlu1 %v2265_v60, %s2026_s25 }
  0xe8   :  { %531 = vrot.lane.b32.xlu2 %v2214_v43, %s2027_s26  ;;  %1808 = vrot.lane.b32.xlu0 %v1817_v45, %s2026_s25 }
  0xe9   :  { %1888 = vrot.lane.b32.xlu1 %v2265_v60, %s2029_s28 }
  0xea   :  { %v2276_v61 = vpop.permute.xlu2 %1703 }
  0xeb   :  { %v1706_v17 = vunpack.i.h.bf16 %v2276_v61 }
  0xf0   :  { %1843 = vrot.lane.b32.xlu2 %v1847_v53, %s2026_s25  ;;  %1813 = vrot.lane.b32.xlu0 %v1817_v45, %s2029_s28 }
  0xf1   :  { %1898 = vrot.lane.b32.xlu1 %v2265_v60, %s2030_s29 }
  0xf2   :  { %v2282_v62 = vpop.permute.xlu2 %1713 }
  0xf3   :  { %v1716_v40 = vunpack.i.h.bf16 %v2282_v62 }
  0xf8   :  { %1858 = vrot.lane.b32.xlu2 %v1847_v53, %s2030_s29  ;;  %1823 = vrot.lane.b32.xlu0 %v1817_v45, %s2030_s29 }
  0xf9   :  { %1908 = vrot.lane.b32.xlu1 %v2265_v60, %s2032_s10 }
  0xfa   :  { %v2289_v1 = vpop.permute.xlu2 %1723 }
  0xfb   :  { %v3156_v25 = vunpack.i.h.bf16 %v2289_v1 }
 0x100   :  { %1868 = vrot.lane.b32.xlu2 %v1847_v53, %s2032_s10  ;;  %1833 = vrot.lane.b32.xlu0 %v1817_v45, %s2032_s10 }
 0x101   :  { %1923 = vrot.lane.b32.xlu1 %v1922_v3, %s2027_s26 }
 0x102   :  { %v2298_v5 = vpop.permute.xlu2 %1728  ;;  %v2300_v6 = vpop.permute.xlu0 %1693 }
 0x103   :  { %v3133_v7 = vunpack.i.h.bf16 %v2298_v5  ;;  %v1730_v8 = vunpack.i.l.bf16 %v2298_v5  ;;  %v1689_v9 = vpop.permute.xlu1 %1688  ;;  %v3153_v26 = vunpack.i.h.bf16 %v2300_v6 }
 0x104   :  { %v1691_v10 = vunpack.i.h.bf16 %v1689_v9  ;;  %v1690_v11 = vunpack.i.l.bf16 %v1689_v9 }
 0x105   :  { %v2307_v12 = vsel %vm545_vm2, %v1730_v8, %v3133_v7 }
 0x106   :  { %v546_v13 = vsel %vm545_vm2, %v1690_v11, %v1691_v10  ;;  %v547_v14 = vsel %vm545_vm2, %v1691_v10, %v1730_v8  ;;  %v1927_v10 = vpack.i.bf16 %v255_v63, %v2291_v2  ;;  %v1952_v11 = vpack.i.bf16 %v2341_v38, %v2365_v0 }
 0x107   :  { %811 = vmatpush.msrb.mxu2 %v546_v13  ;;  %863 = vmatpush.msra.mxu0 %v547_v14 }
 0x108   :  { %1893 = vrot.lane.b32.xlu2 %v2265_v60, %s2025_s1  ;;  %1918 = vrot.lane.b32.xlu0 %v1917_v15, %s2027_s26  ;;  %v247_v15 = vpop.f32.mrf.mxu1 }
 0x109   :  { %465 = vrot.lane.b32.xlu1 %v2291_v2, %s2026_s25  ;;  %v248_v56 = vadd.f32 %v247_v15, %v2225_v48 }
 0x10a   :  { %v2318_v19 = vpop.permute.xlu2 %1733  ;;  %v2320_v23 = vpop.permute.xlu0 %1698 }
 0x10b   :  { %v3148_v27 = vunpack.i.l.bf16 %v2318_v19  ;;  %v2324_v28 = vpop.permute.xlu1 %1783  ;;  %v3152_v47 = vunpack.i.h.bf16 %v2320_v23  ;;  %v267_v63 = vmax.f32 %v248_v56, 0.0 }
 0x10d   :  { %v2331_v33 = vsel %vm487_vm3, %v3153_v26, %v3148_v27  ;;  %v1957_v15 = vpack.i.bf16 %v267_v63, %v2365_v0  ;;  %v1705_v27 = vunpack.i.l.bf16 %v2276_v61 }
 0x10f   :  { %v747_v61 = vsel %vm746_vm6, %v1705_v27, %v1706_v17 }
 0x110   :  { %1903 = vrot.lane.b32.xlu2 %v2265_v60, %s2028_s27  ;;  %349 = vrot.lane.b32.xlu0 %v2291_v2, %s2030_s29 }
 0x111   :  { %407 = vrot.lane.b32.xlu1 %v2291_v2, %s2029_s28 }
 0x112   :  { %v2343_v44 = vpop.permute.xlu2 %1738  ;;  %v2345_v45 = vpop.permute.xlu0 %1708 }
 0x113   :  { %v3143_v24 = vunpack.i.l.bf16 %v2343_v44  ;;  %v2349_v53 = vpop.permute.xlu1 %1793  ;;  %v3151_v16 = vunpack.i.h.bf16 %v2345_v45 }
 0x115   :  { %v2356_v54 = vsel %vm429_vm4, %v3152_v47, %v3143_v24 }
 0x118   :  { %1913 = vrot.lane.b32.xlu2 %v2265_v60, %s2031_s30  ;;  %1938 = vrot.lane.b32.xlu0 %v1937_v57, %s2028_s27 }
 0x119   :  { %1933 = vrot.lane.b32.xlu1 %v1937_v57, %s2025_s1 }
 0x11a   :  { %v2367_v3 = vpop.permute.xlu2 %1748  ;;  %v2369_v8 = vpop.permute.xlu0 %1718 }
 0x11b   :  { %v3139_v4 = vunpack.i.l.bf16 %v2367_v3  ;;  %v2373_v9 = vpop.permute.xlu1 %1818  ;;  %v3147_v52 = vunpack.i.h.bf16 %v2369_v8 }
 0x11d   :  { %v2380_v60 = vsel %vm371_vm5, %v3151_v16, %v3139_v4 }
 0x120   :  { %1928 = vrot.lane.b32.xlu2 %v1927_v10, %s2025_s1  ;;  %1953 = vrot.lane.b32.xlu0 %v1952_v11, %s2029_s28 }
 0x121   :  { %1943 = vrot.lane.b32.xlu1 %v1952_v11, %s2026_s25 }
 0x122   :  { %v2388_v13 = vpop.permute.xlu2 %1763  ;;  %v2390_v14 = vpop.permute.xlu0 %1743 }
 0x123   :  { %v3137_v34 = vunpack.i.l.bf16 %v2388_v13  ;;  %v3140_v35 = vunpack.i.l.bf16 %v2390_v14  ;;  %v2396_v39 = vpop.permute.xlu1 %1828 }
 0x125   :  { %v2401_v46 = vsel %vm746_vm6, %v1706_v17, %v3140_v35  ;;  %v2408_v55 = vsel %vm612_vm7, %v3156_v25, %v3137_v34 }
 0x128   :  { %291 = vrot.lane.b32.xlu2 %v2291_v2, %s2032_s10  ;;  %1963 = vrot.lane.b32.xlu0 %v1952_v11, %s2030_s29 }
 0x129   :  { %1948 = vrot.lane.b32.xlu1 %v1927_v10, %s2028_s27 }
 0x12a   :  { %v2415_v41 = vpop.permute.xlu2 %1768  ;;  %v2417_v7 = vpop.permute.xlu0 %1753 }
 0x12b   :  { %v3141_v22 = vunpack.i.l.bf16 %v2417_v7  ;;  %v2421_v32 = vpop.permute.xlu1 %1848 }
 0x12c   :  { %v1850_v2 = vunpack.i.l.bf16 %v2421_v32 }
 0x12d   :  { %v2426_v48 = vsel %vm679_vm8, %v1716_v40, %v3141_v22 }
 0x130   :  { %1958 = vrot.lane.b32.xlu2 %v1957_v15, %s2025_s1  ;;  %1988 = vrot.lane.b32.xlu0 %v1957_v15, %s2031_s30  ;;  %s2044_s1 = smov 60  }
 0x131   :  { %1968 = vrot.lane.b32.xlu1 %v1957_v15, %s2028_s27  ;;  %s2046_s27 = smov 58  }
 0x132   :  { %v2432_v56 = vpop.permute.xlu2 %1773  ;;  %v2434_v34 = vpop.permute.xlu0 %1758 }
 0x133   :  { %v3146_v4 = vunpack.i.l.bf16 %v2434_v34  ;;  %v2438_v35 = vpop.permute.xlu1 %1853 }
 0x134   :  { %v3149_v22 = vunpack.i.h.bf16 %v2438_v35  ;;  %v1855_v63 = vunpack.i.l.bf16 %v2438_v35 }
 0x135   :  { %v2447_v15 = vsel %vm313_vm9, %v3147_v52, %v3146_v4 }
 0x136   :  { %v757_v21 = vsel %vm746_vm6, %v1855_v63, %v3149_v22  ;;  %v785_v22 = vld [vmem:[%s3126_s4 + $0x10] sm:$0xff] }
 0x137   :  { %842 = vmatpush.msrb.mxu3 %v757_v21 }
 0x138   :  { %1978 = vrot.lane.b32.xlu2 %v1952_v11, %s2032_s10  ;;  %1993 = vrot.lane.b32.xlu0 %v1952_v11, %s2027_s26  ;;  %s2049_s10 = smov 42  }
 0x139   :  { %1973 = vrot.lane.b32.xlu1 %v1937_v57, %s2031_s30  ;;  %v783_v57 = vld [vmem:[%s3126_s4] sm:$0xff] }
 0x13a   :  { %v2455_v24 = vpop.permute.xlu2 %1838  ;;  %v2457_v31 = vpop.permute.xlu0 %1778 }
 0x13b   :  { %v3150_v51 = vunpack.i.h.bf16 %v2457_v31  ;;  %v1780_v4 = vunpack.i.l.bf16 %v2457_v31  ;;  %v2461_v52 = vpop.permute.xlu1 %1863 }
 0x13c   :  { %v3155_v11 = vunpack.i.h.bf16 %v2461_v52  ;;  %v1865_v63 = vunpack.i.l.bf16 %v2461_v52 }
 0x13d   :  { %v752_v21 = vsel %vm746_vm6, %v1780_v4, %v3150_v51 }
 0x13e   :  { %843 = vmatpush.msrb.mxu3 %v752_v21  ;;  %v690_v16 = vsel %vm679_vm8, %v1865_v63, %v3155_v11  ;;  %v1715_v21 = vunpack.i.l.bf16 %v2282_v62  ;;  %v1091_v62 = vld [vmem:[%s3128_s6 + $0x10] sm:$0xff] }
 0x140   :  { %1983 = vrot.lane.b32.xlu2 %v1927_v10, %s2031_s30  ;;  %788 = vperm.xlu0 %1685, %v783_v57   ;;  %v1089_v57 = vld [vmem:[%s3128_s6] sm:$0xff]  ;;  %v680_v63 = vsel %vm679_vm8, %v1715_v21, %v1716_v40  ;;  %s2048_s30 = smov 56  }
 0x141   :  { %798 = vperm.xlu1 %1686, %v785_v22   ;;  %844 = vmatpush.msrb.mxu3 %v747_v61 }
 0x142   :  { %v2477_v4 = vpop.permute.xlu2 %531  ;;  %v2479_v51 = vpop.permute.xlu0 %1788 }
 0x143   :  { %v3154_v47 = vunpack.i.h.bf16 %v2479_v51  ;;  %v1790_v26 = vunpack.i.l.bf16 %v2479_v51  ;;  %v2487_v10 = vpop.permute.xlu1 %1873  ;;  %845 = vmatpush.msrb.mxu3 %v690_v16 }
 0x144   :  { %v3158_v22 = vunpack.i.h.bf16 %v2487_v10  ;;  %v1875_v27 = vunpack.i.l.bf16 %v2487_v10 }
 0x145   :  { %v685_v17 = vsel %vm679_vm8, %v1790_v26, %v3154_v47  ;;  %v1725_v26 = vunpack.i.l.bf16 %v2289_v1  ;;  %v1770_v47 = vunpack.i.l.bf16 %v2415_v41 }
 0x146   :  { %846 = vmatpush.msrb.mxu3 %v685_v17  ;;  %v623_v16 = vsel %vm612_vm7, %v1875_v27, %v3158_v22  ;;  %v1695_v27 = vunpack.i.l.bf16 %v2300_v6 }
 0x148   :  { %1094 = vperm.xlu0 %1685, %v1089_v57   ;;  %847 = vmatpush.msrb.mxu3 %v680_v63 }
 0x149   :  { %1104 = vperm.xlu1 %1686, %v1091_v62   ;;  %v3181_v62 = vunpack.i.h.bf16 %v2415_v41 }
 0x14a   :  { %v1844_v17 = vpop.permute.xlu2 %1843  ;;  %v2507_v11 = vpop.permute.xlu0 %1798  ;;  %848 = vmatpush.msrb.mxu3 %v623_v16 }
 0x14b   :  { %v1846_v25 = vunpack.i.h.bf16 %v1844_v17  ;;  %v1845_v37 = vunpack.i.l.bf16 %v1844_v17  ;;  %v3162_v40 = vunpack.i.h.bf16 %v2507_v11  ;;  %v1800_v21 = vunpack.i.l.bf16 %v2507_v11  ;;  %v2511_v57 = vpop.permute.xlu1 %1878  ;;  %v1263_v17 = vld [vmem:[%s3130_s8] sm:$0xf]  ;;  %s2036_s8 = smov 118  }
 0x14c   :  { %v1880_v63 = vunpack.i.l.bf16 %v2511_v57  ;;  %v492_v43 = vsel %vm487_vm3, %v1770_v47, %v3181_v62  ;;  %v3184_v61 = vunpack.i.h.bf16 %v2511_v57 }
 0x14d   :  { %v496_v22 = vsel %vm487_vm3, %v1845_v37, %v1846_v25  ;;  %v618_v16 = vsel %vm612_vm7, %v1800_v21, %v3162_v40  ;;  %v3182_v37 = vunpack.i.h.bf16 %v2289_v1  ;;  %v3168_v21 = vunpack.i.h.bf16 %v2432_v56 }
 0x14e   :  { %812 = vmatpush.msrb.mxu2 %v496_v22  ;;  %849 = vmatpush.msrb.mxu3 %v618_v16  ;;  %v1775_v22 = vunpack.i.l.bf16 %v2432_v56  ;;  %v3183_v16 = vunpack.i.h.bf16 %v2300_v6  ;;  %v554_v59 = vsel %vm545_vm2, %v1880_v63, %v3184_v61  ;;  %v3185_v6 = vunpack.i.h.bf16 %v2421_v32 }
 0x14f   :  { %v613_v38 = vsel %vm612_vm7, %v1725_v26, %v3182_v37  ;;  %v1700_v26 = vunpack.i.l.bf16 %v2320_v23 }
 0x150   :  { %813 = vmatpush.msrb.mxu2 %v492_v43  ;;  %850 = vmatpush.msrb.mxu3 %v613_v38  ;;  %v488_v40 = vsel %vm487_vm3, %v1695_v27, %v3183_v16  ;;  %v438_v27 = vsel %vm429_vm4, %v1850_v2, %v3185_v6  ;;  %v2564_v2 = vld [vmem:[%s3125_s3 + $0x8] sm:$0xff]  ;;  %v3166_v16 = vunpack.i.h.bf16 %v2324_v28  ;;  %v1785_v6 = vunpack.i.l.bf16 %v2324_v28 }
 0x151   :  { %1266 = vperm.xlu1 %1686, %v1263_v17  }
 0x152   :  { %v2539_v47 = vpop.permute.xlu2 %1858  ;;  %v2541_v1 = vpop.permute.xlu0 %1803  ;;  %814 = vmatpush.msrb.mxu2 %v488_v40  ;;  %851 = vmatpush.msrb.mxu3 %v554_v59  ;;  %v434_v59 = vsel %vm429_vm4, %v1775_v22, %v3168_v21 }
 0x153   :  { %v3164_v43 = vunpack.i.h.bf16 %v2541_v1  ;;  %v1805_v38 = vunpack.i.l.bf16 %v2541_v1  ;;  %v2546_v62 = vpop.permute.xlu1 %1883  ;;  %v3167_v40 = vunpack.i.h.bf16 %v2539_v47  ;;  %v1860_v17 = vunpack.i.l.bf16 %v2539_v47 }
 0x154   :  { %v3165_v61 = vunpack.i.h.bf16 %v2546_v62  ;;  %v1885_v63 = vunpack.i.l.bf16 %v2546_v62  ;;  %815 = vmatpush.msrb.mxu2 %v438_v27  ;;  %v3186_v27 = vunpack.i.h.bf16 %v2320_v23 }
 0x155   :  { %v550_v37 = vsel %vm545_vm2, %v1805_v38, %v3164_v43 }
 0x156   :  { %816 = vmatpush.msrb.mxu2 %v434_v59  ;;  %852 = vmatpush.msrb.mxu3 %v550_v37  ;;  %v497_v22 = vsel %vm487_vm3, %v1846_v25, %v1885_v63  ;;  %v430_v38 = vsel %vm429_vm4, %v1700_v26, %v3186_v27  ;;  %v498_v43 = vsel %vm487_vm3, %v1885_v63, %v3165_v61  ;;  %v1710_v59 = vunpack.i.l.bf16 %v2345_v45 }
 0x157   :  { %864 = vmatpush.msra.mxu0 %v497_v22  ;;  %1610 = vmatmul.msk.f32.vlgmr.msrb.gmra.mxu3 %vm801_vm10, %v2564_v2  ;;  %v380_v25 = vsel %vm371_vm5, %v1860_v17, %v3167_v40  ;;  %v376_v26 = vsel %vm371_vm5, %v1785_v6, %v3166_v16  ;;  %v3187_v6 = vunpack.i.h.bf16 %v2345_v45  ;;  %v3188_v40 = vunpack.i.h.bf16 %v2415_v41 }
 0x158   :  { %915 = vmatpush.msra.mxu3 %v2307_v12  ;;  %817 = vmatpush.msrb.mxu2 %v430_v38  ;;  %v3190_v41 = vunpack.i.h.bf16 %v2318_v19 }
 0x159   :  { %v372_v16 = vsel %vm371_vm5, %v1710_v59, %v3187_v6 }
 0x15a   :  { %916 = vmatpush.msra.mxu3 %v498_v43  ;;  %v2582_v12 = vpop.permute.xlu2 %1868  ;;  %v2584_v23 = vpop.permute.xlu0 %1808  ;;  %818 = vmatpush.msrb.mxu2 %v380_v25  ;;  %v1795_v25 = vunpack.i.l.bf16 %v2349_v53 }
 0x15b   :  { %v1870_v37 = vunpack.i.l.bf16 %v2582_v12  ;;  %v1811_v22 = vunpack.i.h.bf16 %v2584_v23  ;;  %v1810_v43 = vunpack.i.l.bf16 %v2584_v23  ;;  %v2593_v27 = vpop.permute.xlu1 %1888  ;;  %v3189_v38 = vunpack.i.h.bf16 %v2582_v12  ;;  %v1090_v23 = vld [vmem:[%s3128_s6 + $0x8] sm:$0xff]  ;;  %s2055_s6 = smov 32  }
 0x15c   :  { %819 = vmatpush.msrb.mxu2 %v376_v26  ;;  %v1890_v61 = vunpack.i.l.bf16 %v2593_v27  ;;  %v3172_v17 = vunpack.i.h.bf16 %v2593_v27  ;;  %v1720_v26 = vunpack.i.l.bf16 %v2369_v8 }
 0x15d   :  { %v493_v21 = vsel %vm487_vm3, %v3188_v40, %v1810_v43  ;;  %v494_v63 = vsel %vm487_vm3, %v1810_v43, %v1811_v22  ;;  %v322_v45 = vsel %vm313_vm9, %v1870_v37, %v3189_v38  ;;  %v3191_v40 = vunpack.i.l.bf16 %v2318_v19  ;;  %v2628_v37 = vld [vmem:[%s3125_s3 + $0x18] sm:$0xff] }
 0x15e   :  { %820 = vmatpush.msrb.mxu2 %v372_v16  ;;  %865 = vmatpush.msra.mxu0 %v493_v21  ;;  %v3192_v16 = vunpack.i.h.bf16 %v2349_v53  ;;  %v440_v6 = vsel %vm429_vm4, %v1890_v61, %v3172_v17 }
 0x15f   :  { %917 = vmatpush.msra.mxu3 %v494_v63  ;;  %v490_v59 = vsel %vm487_vm3, %v3191_v40, %v3190_v41  ;;  %v3193_v63 = vunpack.i.h.bf16 %v2421_v32  ;;  %v3194_v40 = vunpack.i.h.bf16 %v2369_v8 }
 0x160   :  { %821 = vmatpush.msrb.mxu2 %v322_v45  ;;  %866 = vmatpush.msra.mxu0 %v2331_v33  ;;  %v318_v21 = vsel %vm313_vm9, %v1795_v25, %v3192_v16  ;;  %v3170_v16 = vunpack.i.h.bf16 %v2343_v44 }
 0x161   :  { %918 = vmatpush.msra.mxu3 %v490_v59  ;;  %v439_v43 = vsel %vm429_vm4, %v3193_v63, %v1890_v61  ;;  %v314_v59 = vsel %vm313_vm9, %v1720_v26, %v3194_v40  ;;  %v1820_v26 = vunpack.i.l.bf16 %v2373_v9 }
 0x162   :  { %v2630_v33 = vpop.permute.xlu2 %1893  ;;  %v2632_v38 = vpop.permute.xlu0 %1813  ;;  %822 = vmatpush.msrb.mxu2 %v318_v21  ;;  %867 = vmatpush.msra.mxu0 %v439_v43  ;;  %v3195_v21 = vunpack.i.h.bf16 %v2432_v56  ;;  %v3196_v43 = vunpack.i.h.bf16 %v2438_v35  ;;  %v3198_v35 = vmax.f32 %v2185_v29, 0.0  ;;  %v2680_v29 = vld [vmem:[%s3125_s3] sm:$0xff] }
 0x163   :  { %v1895_v25 = vunpack.i.l.bf16 %v2630_v33  ;;  %v3171_v32 = vunpack.i.h.bf16 %v2632_v38  ;;  %v1815_v45 = vunpack.i.l.bf16 %v2632_v38  ;;  %v2640_v41 = vpop.permute.xlu1 %1898  ;;  %919 = vmatpush.msra.mxu3 %v440_v6  ;;  %v1896_v56 = vunpack.i.h.bf16 %v2630_v33 }
 0x164   :  { %823 = vmatpush.msrb.mxu2 %v314_v59  ;;  %1611 = vmatmul.msk.f32.gmra.mxu3 %vm801_vm10, %v2628_v37  ;;  %v1900_v61 = vunpack.i.l.bf16 %v2640_v41  ;;  %v3169_v40 = vunpack.i.h.bf16 %v2640_v41  ;;  %v3197_v59 = vmax.f32 %v2228_v49, 0.0 }
 0x165   :  { %v435_v63 = vsel %vm429_vm4, %v3195_v21, %v1815_v45  ;;  %v758_v6 = vsel %vm746_vm6, %v3196_v43, %v1895_v25  ;;  %v436_v8 = vsel %vm429_vm4, %v1815_v45, %v3171_v32  ;;  %v3199_v21 = vunpack.i.h.bf16 %v2457_v31  ;;  %v2685_v31 = vld [vmem:[%s3125_s3 + $0x28] sm:$0xff] }
 0x166   :  { %824 = vmatpush.msrb.mxu2 %v3197_v59  ;;  %868 = vmatpush.msra.mxu0 %v435_v63  ;;  %v3200_v43 = vunpack.i.l.bf16 %v2343_v44  ;;  %v3201_v63 = vunpack.i.h.bf16 %v2539_v47  ;;  %v3202_v47 = vmax.f32 %v2168_v18, 0.0  ;;  %v1746_v18 = vunpack.i.h.bf16 %v2390_v14 }
 0x167   :  { %894 = vmatpush.msra.mxu1 %v758_v6  ;;  %920 = vmatpush.msra.mxu3 %v436_v8  ;;  %v753_v45 = vsel %vm746_vm6, %v3199_v21, %v1820_v26 }
 0x168   :  { %825 = vmatpush.msrb.mxu2 %v3198_v35  ;;  %869 = vmatpush.msra.mxu0 %v2356_v54  ;;  %v432_v49 = vsel %vm429_vm4, %v3200_v43, %v3170_v16  ;;  %v381_v6 = vsel %vm371_vm5, %v3201_v63, %v1900_v61  ;;  %v1821_v54 = vunpack.i.h.bf16 %v2373_v9  ;;  %v382_v35 = vsel %vm371_vm5, %v1900_v61, %v3169_v40 }
 0x169   :  { %895 = vmatpush.msra.mxu1 %v753_v45  ;;  %921 = vmatpush.msra.mxu3 %v432_v49  ;;  %v3175_v63 = vunpack.i.h.bf16 %v2367_v3  ;;  %v759_v61 = vsel %vm746_vm6, %v1895_v25, %v1896_v56  ;;  %v3204_v40 = vunpack.i.h.bf16 %v2461_v52  ;;  %v3205_v52 = vunpack.i.h.bf16 %v2479_v51 }
 0x16a   :  { %v2688_v8 = vpop.permute.xlu2 %1903  ;;  %v2690_v59 = vpop.permute.xlu0 %1823  ;;  %826 = vmatpush.msrb.mxu2 %v3202_v47  ;;  %870 = vmatpush.msra.mxu0 %v381_v6  ;;  %v1830_v6 = vunpack.i.l.bf16 %v2396_v39  ;;  %v3208_v51 = vunpack.i.h.bf16 %v2582_v12 }
 0x16b   :  { %v1905_v21 = vunpack.i.l.bf16 %v2688_v8  ;;  %v1826_v45 = vunpack.i.h.bf16 %v2690_v59  ;;  %v1825_v43 = vunpack.i.l.bf16 %v2690_v59  ;;  %v2700_v49 = vpop.permute.xlu1 %1908  ;;  %896 = vmatpush.msra.mxu1 %v2401_v46  ;;  %922 = vmatpush.msra.mxu3 %v382_v35  ;;  %v3203_v46 = vunpack.i.h.bf16 %v2324_v28 }
 0x16c   :  { %827 = vmatmul.f32.vlgmr.msrb.gmra.mxu2 %v2680_v29  ;;  %1612 = vmatmul.msk.f32.gmra.mxu3 %vm801_vm10, %v2685_v31  ;;  %v1910_v47 = vunpack.i.l.bf16 %v2700_v49  ;;  %v3174_v25 = vunpack.i.h.bf16 %v2688_v8  ;;  %v3173_v17 = vunpack.i.h.bf16 %v2700_v49  ;;  %v686_v28 = vsel %vm679_vm8, %v3205_v52, %v1830_v6 }
 0x16d   :  { %946 = vmatpush.msra.mxu2 %v759_v61  ;;  %v377_v35 = vsel %vm371_vm5, %v3203_v46, %v1825_v43  ;;  %v691_v16 = vsel %vm679_vm8, %v3204_v40, %v1905_v21  ;;  %v378_v32 = vsel %vm371_vm5, %v1825_v43, %v1826_v45  ;;  %v754_v61 = vsel %vm746_vm6, %v1820_v26, %v1821_v54 }
 0x16e   :  { %871 = vmatpush.msra.mxu0 %v377_v35  ;;  %897 = vmatpush.msra.mxu1 %v691_v16  ;;  %v1831_v40 = vunpack.i.h.bf16 %v2396_v39  ;;  %v3206_v43 = vunpack.i.l.bf16 %v2390_v14  ;;  %v3207_v16 = vunpack.i.l.bf16 %v2367_v3  ;;  %v323_v26 = vsel %vm313_vm9, %v3208_v51, %v1910_v47  ;;  %v2748_v35 = vld [vmem:[%s3125_s3 + $0x10] sm:$0xff] }
 0x16f   :  { %947 = vmatpush.msra.mxu2 %v754_v61  ;;  %923 = vmatpush.msra.mxu3 %v378_v32  ;;  %v692_v61 = vsel %vm679_vm8, %v1905_v21, %v3174_v25  ;;  %v324_v12 = vsel %vm313_vm9, %v1910_v47, %v3173_v17  ;;  %v1761_v51 = vunpack.i.h.bf16 %v2434_v34  ;;  %v1840_v47 = vunpack.i.l.bf16 %v2455_v24 }
 0x170   :  { %v749_v46 = vsel %vm746_vm6, %v3206_v43, %v1746_v18  ;;  %872 = vmatpush.msra.mxu0 %v2380_v60  ;;  %898 = vmatpush.msra.mxu1 %v686_v28  ;;  %v374_v32 = vsel %vm371_vm5, %v3207_v16, %v3175_v63  ;;  %v1756_v60 = vunpack.i.h.bf16 %v2417_v7  ;;  %v3210_v17 = vunpack.i.h.bf16 %v2487_v10 }
 0x171   :  { %948 = vmatpush.msra.mxu2 %v749_v46  ;;  %924 = vmatpush.msra.mxu3 %v374_v32  ;;  %v1841_v63 = vunpack.i.h.bf16 %v2455_v24  ;;  %v3212_v10 = vunpack.i.h.bf16 %v2507_v11  ;;  %v2803_v11 = vld [vmem:[%s3125_s3 + $0x20] sm:$0xff]  ;;  %s2051_s3 = smov 40  }
 0x172   :  { %v2754_v52 = vpop.permute.xlu2 %1913  ;;  %v2756_v28 = vpop.permute.xlu0 %1833  ;;  %873 = vmatpush.msra.mxu0 %v323_v26  ;;  %899 = vmatpush.msra.mxu1 %v2426_v48  ;;  %v687_v48 = vsel %vm679_vm8, %v1830_v6, %v1831_v40  ;;  %v3209_v26 = vunpack.i.h.bf16 %v2349_v53  ;;  %v3211_v6 = vunpack.i.l.bf16 %v2417_v7 }
 0x173   :  { %949 = vmatpush.msra.mxu2 %v692_v61  ;;  %v1916_v43 = vunpack.i.h.bf16 %v2754_v52  ;;  %v1915_v46 = vunpack.i.l.bf16 %v2754_v52  ;;  %v1836_v16 = vunpack.i.h.bf16 %v2756_v28  ;;  %v1835_v21 = vunpack.i.l.bf16 %v2756_v28  ;;  %v1924_v32 = vpop.permute.xlu1 %1923  ;;  %925 = vmatpush.msra.mxu3 %v324_v12 }
 0x174   :  { %830 = vmatmul.f32.gmra.mxu2 %v2748_v35 }
 0x175   :  { %950 = vmatpush.msra.mxu2 %v687_v48  ;;  %v319_v61 = vsel %vm313_vm9, %v3209_v26, %v1835_v21  ;;  %v624_v25 = vsel %vm612_vm7, %v3210_v17, %v1915_v46  ;;  %v320_v12 = vsel %vm313_vm9, %v1835_v21, %v1836_v16  ;;  %v682_v48 = vsel %vm679_vm8, %v3211_v6, %v1756_v60 }
 0x176   :  { %874 = vmatpush.msra.mxu0 %v319_v61  ;;  %900 = vmatpush.msra.mxu1 %v624_v25  ;;  %v625_v53 = vsel %vm612_vm7, %v1915_v46, %v1916_v43  ;;  %v619_v17 = vsel %vm612_vm7, %v3212_v10, %v1840_v47  ;;  %v1766_v21 = vunpack.i.h.bf16 %v2388_v13  ;;  %v1926_v26 = vunpack.i.h.bf16 %v1924_v32 }
 0x177   :  { %951 = vmatpush.msra.mxu2 %v682_v48  ;;  %926 = vmatpush.msra.mxu3 %v320_v12  ;;  %v3213_v25 = vunpack.i.l.bf16 %v2434_v34  ;;  %v620_v46 = vsel %vm612_vm7, %v1840_v47, %v1841_v63  ;;  %v3214_v6 = vmax.f32 %v2231_v50, 0.0  ;;  %v3215_v47 = vunpack.i.l.bf16 %v2388_v13 }
 0x178   :  { %875 = vmatpush.msra.mxu0 %v2447_v15  ;;  %901 = vmatpush.msra.mxu1 %v619_v17  ;;  %v1925_v17 = vunpack.i.l.bf16 %v1924_v32 }
 0x179   :  { %v316_v61 = vsel %vm313_vm9, %v3213_v25, %v1761_v51  ;;  %952 = vmatpush.msra.mxu2 %v625_v53  ;;  %v615_v50 = vsel %vm612_vm7, %v3215_v47, %v1766_v21  ;;  %v3217_v25 = vunpack.i.h.bf16 %v2511_v57  ;;  %v3221_v57 = vunpack.i.h.bf16 %v2298_v5  ;;  %v784_v5 = vld [vmem:[%s3126_s4 + $0x8] sm:$0xff]  ;;  %s2053_s4 = smov 36  }
 0x17a   :  { %927 = vmatpush.msra.mxu3 %v316_v61  ;;  %v2808_v12 = vpop.permute.xlu2 %1928  ;;  %v2810_v15 = vpop.permute.xlu0 %1918  ;;  %876 = vmatpush.msra.mxu0 %v3214_v6  ;;  %v3219_v6 = vmax.f32 %v2171_v20, 0.0 }
 0x17b   :  { %902 = vmatpush.msra.mxu1 %v2408_v55  ;;  %953 = vmatpush.msra.mxu2 %v620_v46  ;;  %v1921_v48 = vunpack.i.h.bf16 %v2810_v15  ;;  %v1920_v53 = vunpack.i.l.bf16 %v2810_v15  ;;  %v2817_v10 = vpop.permute.xlu1 %465  ;;  %v3216_v55 = vmax.f32 %v2188_v30, 0.0  ;;  %v555_v61 = vsel %vm545_vm2, %v3217_v25, %v1926_v26 }
 0x17c   :  { %928 = vmatpush.msra.mxu3 %v2259_v58  ;;  %833 = vmatmul.f32.gmra.mxu2 %v2803_v11  ;;  %v3218_v58 = vunpack.i.h.bf16 %v2541_v1  ;;  %v3220_v30 = vmax.f32 %v2200_v36, 0.0  ;;  %v549_v1 = vsel %vm545_vm2, %v3221_v57, %v1925_v17 }
 0x17d   :  { %877 = vmatpush.msra.mxu0 %v3216_v55  ;;  %954 = vmatpush.msra.mxu2 %v615_v50  ;;  %v556_v46 = vsel %vm545_vm2, %v1926_v26, %v1920_v53 }
 0x17e   :  { %903 = vmatpush.msra.mxu1 %v555_v61  ;;  %v551_v32 = vsel %vm545_vm2, %v3218_v58, %v1921_v48  ;;  %929 = vmatpush.msra.mxu3 %v2212_v42  ;;  %v552_v42 = vsel %vm545_vm2, %v1921_v48, %v2477_v4  ;;  %v1931_v58 = vunpack.i.h.bf16 %v2808_v12 }
 0x17f   :  { %878 = vmatpush.msra.mxu0 %v3219_v6  ;;  %955 = vmatpush.msra.mxu2 %v556_v46 }
 0x180   :  { %904 = vmatpush.msra.mxu1 %v551_v32  ;;  %930 = vmatpush.msra.mxu3 %v3220_v30  ;;  %v1930_v32 = vunpack.i.l.bf16 %v2808_v12 }
 0x181   :  { %879 = vmatmul.f32.vlgmr.msra.gmra.mxu0 %v2680_v29  ;;  %931 = vmatmul.f32.vlgmr.msra.gmra.mxu3 %v2680_v29 }
 0x182   :  { %967 = vmatpush.msrb.mxu1 %v549_v1  ;;  %956 = vmatpush.msra.mxu2 %v552_v42  ;;  %v2851_v20 = vpop.permute.xlu2 %291  ;;  %v2853_v36 = vpop.permute.xlu0 %349  ;;  %v751_v33 = vsel %vm746_vm6, %v1930_v32, %v1931_v58  ;;  %v750_v12 = vsel %vm746_vm6, %v1746_v18, %v1930_v32  ;;  %v3225_v58 = vunpack.i.h.bf16 %v2632_v38 }
 0x183   :  { %1613 = vmatmul.msk.f32.vlgmr.msra.gmra.mxu1 %vm801_vm10, %v2564_v2  ;;  %v2855_v26 = vpop.permute.xlu1 %407  ;;  %793 = vperm.xlu2 %1997, %v784_v5  }
 0x184   :  { %1019 = vmatpush.msrb.mxu2 %v1925_v17 }
 0x185   :  { %1616 = vmatmul.msk.f32.vlgmr.msra.gmra.mxu2 %vm801_vm10, %v2564_v2 }
 0x189   :  { %882 = vmatmul.f32.gmra.mxu0 %v2748_v35  ;;  %934 = vmatmul.f32.gmra.mxu3 %v2748_v35 }
 0x18a   :  { %v1959_v48 = vpop.permute.xlu2 %1958  ;;  %v2866_v47 = vpop.permute.xlu0 %1938 }
 0x18b   :  { %1614 = vmatmul.msk.f32.gmra.mxu1 %vm801_vm10, %v2628_v37  ;;  %v1961_v17 = vunpack.i.h.bf16 %v1959_v48  ;;  %v1960_v50 = vunpack.i.l.bf16 %v1959_v48  ;;  %v1934_v55 = vpop.permute.xlu1 %1933  ;;  %1099 = vperm.xlu2 %1997, %v1090_v23  }
 0x18c   :  { %v1936_v25 = vunpack.i.h.bf16 %v1934_v55  ;;  %v1935_v61 = vunpack.i.l.bf16 %v1934_v55 }
 0x18d   :  { %1617 = vmatmul.msk.f32.gmra.mxu2 %vm801_vm10, %v2628_v37  ;;  %v760_v46 = vsel %vm746_vm6, %v1896_v56, %v1960_v50  ;;  %v761_v6 = vsel %vm746_vm6, %v1960_v50, %v1961_v17  ;;  %v3223_v50 = vunpack.i.h.bf16 %v2318_v19 }
 0x18e   :  { %998 = vmatpush.msrb.mxu0 %v760_v46  ;;  %1050 = vmatpush.msrb.mxu3 %v761_v6  ;;  %v756_v30 = vsel %vm746_vm6, %v1935_v61, %v1936_v25  ;;  %v755_v57 = vsel %vm746_vm6, %v1821_v54, %v1935_v61  ;;  %v3222_v54 = vunpack.i.h.bf16 %v2546_v62  ;;  %v3224_v25 = vunpack.i.h.bf16 %v2593_v27 }
 0x18f   :  { %v491_v55 = vsel %vm487_vm3, %v3223_v50, %v2817_v10  ;;  %v3226_v27 = vunpack.i.h.bf16 %v2343_v44  ;;  %vm1529_vm6 = vcmask 326656  }
 0x190   :  { %1051 = vmatpush.msrb.mxu3 %v756_v30  ;;  %999 = vmatpush.msrb.mxu0 %v755_v57  ;;  %v3227_v30 = vunpack.i.h.bf16 %v2640_v41  ;;  %v1940_v57 = vunpack.i.l.bf16 %v2866_v47  ;;  %v3228_v41 = vunpack.i.h.bf16 %v2367_v3  ;;  %v3230_v3 = vunpack.i.h.bf16 %v2700_v49 }
 0x191   :  { %885 = vmatmul.f32.gmra.mxu0 %v2803_v11  ;;  %937 = vmatmul.f32.gmra.mxu3 %v2803_v11  ;;  %v433_v46 = vsel %vm429_vm4, %v3226_v27, %v2855_v26 }
 0x192   :  { %v1954_v56 = vpop.permute.xlu0 %1953  ;;  %1052 = vmatpush.msrb.mxu3 %v751_v33  ;;  %1000 = vmatpush.msrb.mxu0 %v750_v12 }
 0x193   :  { %1615 = vmatmul.msk.f32.gmra.mxu1 %vm801_vm10, %v2685_v31  ;;  %v1944_v1 = vpop.permute.xlu1 %1943  ;;  %v1955_v48 = vunpack.i.l.bf16 %v1954_v56  ;;  %v1956_v18 = vunpack.i.h.bf16 %v1954_v56 }
 0x194   :  { %v1946_v9 = vunpack.i.h.bf16 %v1944_v1  ;;  %v1945_v42 = vunpack.i.l.bf16 %v1944_v1 }
 0x195   :  { %1618 = vmatmul.msk.f32.gmra.mxu2 %vm801_vm10, %v2685_v31  ;;  %v441_v61 = vsel %vm429_vm4, %v3224_v25, %v1955_v48  ;;  %v437_v19 = vsel %vm429_vm4, %v3225_v58, %v1956_v18  ;;  %v3233_v58 = vld [vmem:[#allocation6_spill] sm:$0xff]  ;;  %vm1472_vm4 = vcmask 785408  }
 0x196   :  { %1020 = vmatpush.msrb.mxu2 %v1945_v42  ;;  %v499_v5 = vsel %vm487_vm3, %v3222_v54, %v1945_v42  ;;  %v495_v14 = vsel %vm487_vm3, %v1811_v22, %v1946_v9 }
 0x197   :  { %968 = vmatpush.msrb.mxu1 %v499_v5  ;;  %v3229_v5 = vunpack.i.h.bf16 %v2688_v8 }
 0x198   :  { %1021 = vmatpush.msrb.mxu2 %v1946_v9  ;;  %v375_v9 = vsel %vm371_vm5, %v3228_v41, %v2853_v36 }
 0x199   :  { %969 = vmatpush.msrb.mxu1 %v495_v14 }
 0x19a   :  { %1022 = vmatpush.msrb.mxu2 %v2817_v10  ;;  %v1964_v17 = vpop.permute.xlu0 %1963  ;;  %v1979_v10 = vpop.permute.xlu2 %1978 }
 0x19b   :  { %v1949_v62 = vpop.permute.xlu1 %1948  ;;  %970 = vmatpush.msrb.mxu1 %v491_v55  ;;  %v1965_v22 = vunpack.i.l.bf16 %v1964_v17  ;;  %v1966_v32 = vunpack.i.h.bf16 %v1964_v17  ;;  %v1980_v56 = vunpack.i.l.bf16 %v1979_v10  ;;  %v1981_v42 = vunpack.i.h.bf16 %v1979_v10 }
 0x19c   :  { %1023 = vmatpush.msrb.mxu2 %v1955_v48  ;;  %v1950_v54 = vunpack.i.l.bf16 %v1949_v62  ;;  %v1951_v14 = vunpack.i.h.bf16 %v1949_v62  ;;  %v317_v62 = vsel %vm313_vm9, %v1761_v51, %v2851_v20 }
 0x19d   :  { %971 = vmatpush.msrb.mxu1 %v441_v61  ;;  %v383_v38 = vsel %vm371_vm5, %v3227_v30, %v1965_v22  ;;  %v379_v44 = vsel %vm371_vm5, %v1826_v45, %v1966_v32  ;;  %v321_v50 = vsel %vm313_vm9, %v1836_v16, %v1981_v42  ;;  %vm1474_vm5 = vcmask 916480  }
 0x19e   :  { %1024 = vmatpush.msrb.mxu2 %v1956_v18  ;;  %v683_v49 = vsel %vm679_vm8, %v1756_v60, %v1950_v54 }
 0x19f   :  { %972 = vmatpush.msrb.mxu1 %v437_v19  ;;  %v3235_v19 = vld [vmem:[#allocation5_spill] sm:$0xff] }
 0x1a0   :  { %1025 = vmatpush.msrb.mxu2 %v2855_v26  ;;  %v1941_v26 = vunpack.i.h.bf16 %v2866_v47  ;;  %v325_v47 = vsel %vm313_vm9, %v3230_v3, %v1980_v56  ;;  %v3236_v10 = vmax.f32 %v3235_v19, 0.0 }
 0x1a1   :  { %973 = vmatpush.msrb.mxu1 %v433_v46 }
 0x1a2   :  { %1026 = vmatpush.msrb.mxu2 %v1965_v22  ;;  %v1989_v6 = vpop.permute.xlu0 %1988  ;;  %v1984_v18 = vpop.permute.xlu2 %1983  ;;  %v689_v17 = vsel %vm679_vm8, %v1940_v57, %v1941_v26 }
 0x1a3   :  { %v1969_v33 = vpop.permute.xlu1 %1968  ;;  %974 = vmatpush.msrb.mxu1 %v383_v38  ;;  %v1990_v45 = vunpack.i.l.bf16 %v1989_v6  ;;  %v1991_v8 = vunpack.i.h.bf16 %v1989_v6  ;;  %v1985_v25 = vunpack.i.l.bf16 %v1984_v18  ;;  %v1986_v60 = vunpack.i.h.bf16 %v1984_v18 }
 0x1a4   :  { %v1971_v12 = vunpack.i.h.bf16 %v1969_v33  ;;  %v1970_v1 = vunpack.i.l.bf16 %v1969_v33  ;;  %1027 = vmatpush.msrb.mxu2 %v1966_v32 }
 0x1a5   :  { %975 = vmatpush.msrb.mxu1 %v379_v44  ;;  %v626_v7 = vsel %vm612_vm7, %v1916_v43, %v1990_v45  ;;  %v627_v16 = vsel %vm612_vm7, %v1990_v45, %v1991_v8  ;;  %v3232_v43 = vld [vmem:[#allocation9_spill] sm:$0xff]  ;;  %v616_v22 = vsel %vm612_vm7, %v1766_v21, %v1985_v25  ;;  %v617_v24 = vsel %vm612_vm7, %v1985_v25, %v1986_v60 }
 0x1a6   :  { %1028 = vmatpush.msrb.mxu2 %v2853_v36  ;;  %v693_v48 = vsel %vm679_vm8, %v3229_v5, %v1970_v1  ;;  %v694_v59 = vsel %vm679_vm8, %v1970_v1, %v1971_v12  ;;  %v688_v36 = vsel %vm679_vm8, %v1831_v40, %v1940_v57  ;;  %v684_v40 = vsel %vm679_vm8, %v1950_v54, %v1951_v14 }
 0x1a7   :  { %976 = vmatpush.msrb.mxu1 %v375_v9  ;;  %1001 = vmatpush.msrb.mxu0 %v693_v48  ;;  %v3005_v9 = vld [vmem:[%s3127_s5] sm:$0xff] }
 0x1a8   :  { %1053 = vmatpush.msrb.mxu3 %v694_v59  ;;  %1029 = vmatpush.msrb.mxu2 %v1980_v56 }
 0x1a9   :  { %977 = vmatpush.msrb.mxu1 %v325_v47  ;;  %1002 = vmatpush.msrb.mxu0 %v688_v36  ;;  %v3015_v36 = vld [vmem:[%s3127_s5 + $0x8] sm:$0xff] }
 0x1aa   :  { %1054 = vmatpush.msrb.mxu3 %v689_v17  ;;  %1030 = vmatpush.msrb.mxu2 %v1981_v42  ;;  %v1994_v55 = vpop.permute.xlu0 %1993 }
 0x1ab   :  { %v1974_v39 = vpop.permute.xlu1 %1973  ;;  %978 = vmatpush.msrb.mxu1 %v321_v50  ;;  %1003 = vmatpush.msrb.mxu0 %v683_v49  ;;  %v1995_v23 = vunpack.i.l.bf16 %v1994_v55  ;;  %v1996_v52 = vunpack.i.h.bf16 %v1994_v55 }
 0x1ac   :  { %v1976_v61 = vunpack.i.h.bf16 %v1974_v39  ;;  %v1975_v28 = vunpack.i.l.bf16 %v1974_v39  ;;  %1055 = vmatpush.msrb.mxu3 %v684_v40  ;;  %1031 = vmatpush.msrb.mxu2 %v2851_v20  ;;  %v3231_v20 = vld [vmem:[#allocation7_spill] sm:$0xff] }
 0x1ad   :  { %979 = vmatpush.msrb.mxu1 %v317_v62  ;;  %1004 = vmatpush.msrb.mxu0 %v626_v7  ;;  %v553_v13 = vsel %vm545_vm2, %v2477_v4, %v1996_v52 }
 0x1ae   :  { %1056 = vmatpush.msrb.mxu3 %v627_v16  ;;  %1032 = vmatpush.msrb.mxu2 %v2365_v0  ;;  %v621_v34 = vsel %vm612_vm7, %v1841_v63, %v1975_v28  ;;  %v622_v51 = vsel %vm612_vm7, %v1975_v28, %v1976_v61  ;;  %v3234_v0 = vld [vmem:[#allocation8_spill] sm:$0xff]  ;;  %v557_v63 = vsel %vm545_vm2, %v1920_v53, %v1995_v23  ;;  %vm1456_vm2 = vcmask 818176  }
 0x1af   :  { %980 = vmatpush.msrb.mxu1 %v3231_v20  ;;  %1005 = vmatpush.msrb.mxu0 %v621_v34  ;;  %v1088_v28 = vld [vmem:[%s3127_s5 + $0x10] sm:$0xff]  ;;  %vm1503_vm7 = vcmask 441344   ;;  %s2061_s5 = smov [#allocation2]  }
 0x1b0   :  { %1057 = vmatpush.msrb.mxu3 %v622_v51  ;;  %1033 = vmatpush.msrb.mxu2 %v3232_v43  ;;  %s1572_s19 = sshll.u32 %s2061_s5, 4  ;;  %s1573_s19 = int_to_ptr.vmem [resolvable:$true] %s1572_s19 }
 0x1b1   :  { %981 = vmatpush.msrb.mxu1 %v3233_v58  ;;  %1006 = vmatpush.msrb.mxu0 %v616_v22 }
 0x1b2   :  { %1058 = vmatpush.msrb.mxu3 %v617_v24  ;;  %1034 = vmatpush.msrb.mxu2 %v3234_v0  ;;  %v2996_v32 = vpop.permute.xlu0 %788 }
 0x1b3   :  { %982 = vmatpush.msrb.mxu1 %v3236_v10  ;;  %1007 = vmatpush.msrb.mxu0 %v557_v63  ;;  %v2998_v27 = vpop.permute.xlu1 %798 }
 0x1b4   :  { %1035 = vmatmul.f32.vlgmr.msrb.gmra.mxu2 %v2680_v29  ;;  %1059 = vmatpush.msrb.mxu3 %v1995_v23 }
 0x1b5   :  { %983 = vmatmul.f32.vlgmr.msrb.gmra.mxu1 %v2680_v29  ;;  %1008 = vmatpush.msrb.mxu0 %v553_v13 }
 0x1b6   :  { %1060 = vmatpush.msrb.mxu3 %v1996_v52  ;;  %1619 = vmatmul.msk.f32.vlgmr.msrb.gmra.mxu0 %vm801_vm10, %v2564_v2 }
 0x1b7   :  { %1622 = vmatmul.msk.f32.vlgmr.msrb.gmra.mxu3 %vm801_vm10, %v2564_v2 }
 0x1bc   :  { %1038 = vmatmul.f32.gmra.mxu2 %v2748_v35 }
 0x1bd   :  { %986 = vmatmul.f32.gmra.mxu1 %v2748_v35 }
 0x1be   :  { %1620 = vmatmul.msk.f32.gmra.mxu0 %vm801_vm10, %v2628_v37 }
 0x1bf   :  { %1623 = vmatmul.msk.f32.gmra.mxu3 %vm801_vm10, %v2628_v37 }
 0x1c4   :  { %1041 = vmatmul.f32.gmra.mxu2 %v2803_v11 }
 0x1c5   :  { %989 = vmatmul.f32.gmra.mxu1 %v2803_v11 }
 0x1c6   :  { %1621 = vmatmul.msk.f32.gmra.mxu0 %vm801_vm10, %v2685_v31 }
 0x1c7   :  { %1624 = vmatmul.msk.f32.gmra.mxu3 %vm801_vm10, %v2685_v31 }
 0x1da   :  { %v854_v4 = vpop.f32.mrf.mxu3 }
 0x1dd   :  { %v2993_v21 = vpop.permute.xlu2 %793 }
 0x1e7   :  { %v857_v29 = vpop.f32.mrf.mxu3 }
 0x1ef   :  { %v828_v2 = vpop.f32.mrf.mxu2  ;;  %v860_v15 = vpop.f32.mrf.mxu3 }
 0x1f0   :  { %v829_v6 = vadd.f32 %v828_v2, %v2996_v32 }
 0x1f2   :  { %v855_v57 = vadd.f32 %v854_v4, %v829_v6 }
 0x1f4   :  { %v1071_v41 = vmax.f32 %v855_v57, 0.0 }
 0x1f7   :  { %v831_v35 = vpop.f32.mrf.mxu2 }
 0x1f8   :  { %v832_v53 = vadd.f32 %v831_v35, %v2993_v21 }
 0x1fa   :  { %v858_v30 = vadd.f32 %v857_v29, %v832_v53 }
 0x1fc   :  { %v1076_v12 = vmax.f32 %v858_v30, 0.0 }
 0x1fe   :  { %v880_v37 = vpop.f32.mrf.mxu0 }
 0x1ff   :  { %v834_v11 = vpop.f32.mrf.mxu2  ;;  %v881_v48 = vadd.f32 %v880_v37, %v2996_v32 }
 0x200   :  { %v906_v46 = vpop.f32.mrf.mxu1  ;;  %v835_v31 = vadd.f32 %v834_v11, %v2998_v27 }
 0x201   :  { %v907_v18 = vadd.f32 %v906_v46, %v881_v48 }
 0x202   :  { %v861_v38 = vadd.f32 %v860_v15, %v835_v31 }
 0x203   :  { %v1072_v55 = vmax.f32 %v907_v18, 0.0 }
 0x204   :  { %v1081_v33 = vmax.f32 %v861_v38, 0.0  ;;  %v932_v56 = vpop.f32.mrf.mxu3 }
 0x205   :  { %v933_v25 = vadd.f32 %v932_v56, %v2996_v32 }
 0x206   :  { %v883_v1 = vpop.f32.mrf.mxu0  ;;  %1130 = vmatpush.msra.mxu0 %v1081_v33 }
 0x207   :  { %v884_v42 = vadd.f32 %v883_v1, %v2993_v21 }
 0x208   :  { %v909_v44 = vpop.f32.mrf.mxu1  ;;  %v958_v26 = vpop.f32.mrf.mxu2  ;;  %1131 = vmatpush.msra.mxu0 %v1076_v12 }
 0x209   :  { %v910_v59 = vadd.f32 %v909_v44, %v884_v42  ;;  %v959_v7 = vadd.f32 %v958_v26, %v933_v25  ;;  %v1105_v44 = vpop.permute.xlu1 %1104  ;;  %v1100_v26 = vpop.permute.xlu2 %1099 }
 0x20a   :  { %1132 = vmatpush.msra.mxu0 %v1071_v41 }
 0x20b   :  { %1625 = vmatmul.msk.f32.vlgmr.msra.gmra.mxu0 %vm1107_vm11, %v3005_v9  ;;  %v1077_v8 = vmax.f32 %v910_v59, 0.0  ;;  %v1073_v23 = vmax.f32 %v959_v7, 0.0 }
 0x20c   :  { %v935_v54 = vpop.f32.mrf.mxu3 }
 0x20d   :  { %v936_v17 = vadd.f32 %v935_v54, %v2993_v21  ;;  %v1095_v54 = vpop.permute.xlu0 %1094 }
 0x20e   :  { %v886_v5 = vpop.f32.mrf.mxu0 }
 0x20f   :  { %v887_v14 = vadd.f32 %v886_v5, %v2998_v27 }
 0x210   :  { %v912_v45 = vpop.f32.mrf.mxu1  ;;  %v961_v3 = vpop.f32.mrf.mxu2 }
 0x211   :  { %v913_v47 = vadd.f32 %v912_v45, %v887_v14  ;;  %v962_v39 = vadd.f32 %v961_v3, %v936_v17  ;;  %v1379_v45 = vld.sshfl [vmem:[#allocation1 + $0x10] sm:$0xff pattern:$0x75316420]  ;;  %v1377_v3 = vld.sshfl [vmem:[#allocation1] sm:$0xff pattern:$0x75316420] }
 0x212   :  { %1386 = vrot.lane.b32.xlu1 %v1379_v45, %s2026_s25  ;;  %1382 = vrot.lane.b32.xlu2 %v1377_v3, %s2026_s25 }
 0x213   :  { %v1082_v50 = vmax.f32 %v913_v47, 0.0  ;;  %1626 = vmatmul.msk.f32.gmra.mxu0 %vm1107_vm11, %v3015_v36  ;;  %v1078_v60 = vmax.f32 %v962_v39, 0.0 }
 0x214   :  { %v938_v49 = vpop.f32.mrf.mxu3 }
 0x215   :  { %1156 = vmatpush.msra.mxu1 %v1082_v50  ;;  %v939_v40 = vadd.f32 %v938_v49, %v2998_v27 }
 0x217   :  { %1157 = vmatpush.msra.mxu1 %v1077_v8 }
 0x218   :  { %v964_v62 = vpop.f32.mrf.mxu2 }
 0x219   :  { %v965_v61 = vadd.f32 %v964_v62, %v939_v40  ;;  %1158 = vmatpush.msra.mxu1 %v1072_v55 }
 0x21a   :  { %1628 = vmatmul.msk.f32.vlgmr.msra.gmra.mxu1 %vm1107_vm11, %v3005_v9 }
 0x21b   :  { %v1083_v16 = vmax.f32 %v965_v61, 0.0  ;;  %1627 = vmatmul.msk.f32.gmra.mxu0 %vm1107_vm11, %v1088_v28 }
 0x21d   :  { %1182 = vmatpush.msra.mxu3 %v1083_v16 }
 0x21f   :  { %1183 = vmatpush.msra.mxu3 %v1078_v60 }
 0x221   :  { %1184 = vmatpush.msra.mxu3 %v1073_v23 }
 0x222   :  { %1629 = vmatmul.msk.f32.gmra.mxu1 %vm1107_vm11, %v3015_v36  ;;  %1631 = vmatmul.msk.f32.vlgmr.msra.gmra.mxu3 %vm1107_vm11, %v3005_v9 }
 0x22a   :  { %1630 = vmatmul.msk.f32.gmra.mxu1 %vm1107_vm11, %v1088_v28  ;;  %1632 = vmatmul.msk.f32.gmra.mxu3 %vm1107_vm11, %v3015_v36 }
 0x232   :  { %1633 = vmatmul.msk.f32.gmra.mxu3 %vm1107_vm11, %v1088_v28  ;;  %v984_v34 = vpop.f32.mrf.mxu1 }
 0x233   :  { %v1010_v51 = vpop.f32.mrf.mxu0  ;;  %v985_v19 = vadd.f32 %v984_v34, %v2996_v32  ;;  %v1380_v34 = vld.sshfl [vmem:[#allocation1 + $0x18] sm:$0xff pattern:$0x75316420] }
 0x234   :  { %1388 = vrot.lane.b32.xlu2 %v1380_v34, %s2026_s25 }
 0x235   :  { %v1011_v29 = vadd.f32 %v1010_v51, %v985_v19  ;;  %v1381_v51 = vld.sshfl [vmem:[#allocation1 + $0x20] sm:$0xff pattern:$0x75316420] }
 0x237   :  { %v1036_v20 = vpop.f32.mrf.mxu2  ;;  %v1074_v31 = vmax.f32 %v1011_v29, 0.0 }
 0x238   :  { %v1037_v11 = vadd.f32 %v1036_v20, %v2996_v32 }
 0x23a   :  { %v987_v52 = vpop.f32.mrf.mxu1  ;;  %v1062_v43 = vpop.f32.mrf.mxu3 }
 0x23b   :  { %v1013_v22 = vpop.f32.mrf.mxu0  ;;  %v988_v24 = vadd.f32 %v987_v52, %v2993_v21  ;;  %v1063_v57 = vadd.f32 %v1062_v43, %v1037_v11 }
 0x23d   :  { %v1014_v4 = vadd.f32 %v1013_v22, %v988_v24  ;;  %v1075_v56 = vmax.f32 %v1063_v57, 0.0 }
 0x23f   :  { %v1039_v58 = vpop.f32.mrf.mxu2  ;;  %v1079_v46 = vmax.f32 %v1014_v4, 0.0 }
 0x240   :  { %v1040_v35 = vadd.f32 %v1039_v58, %v2993_v21 }
 0x242   :  { %v990_v0 = vpop.f32.mrf.mxu1  ;;  %v1065_v63 = vpop.f32.mrf.mxu3 }
 0x243   :  { %v991_v10 = vadd.f32 %v990_v0, %v2998_v27  ;;  %v1016_v13 = vpop.f32.mrf.mxu0  ;;  %v1066_v30 = vadd.f32 %v1065_v63, %v1040_v35 }
 0x245   :  { %v1017_v2 = vadd.f32 %v1016_v13, %v991_v10  ;;  %v1080_v21 = vmax.f32 %v1066_v30, 0.0 }
 0x247   :  { %v1084_v15 = vmax.f32 %v1017_v2, 0.0  ;;  %v1042_v53 = vpop.f32.mrf.mxu2 }
 0x248   :  { %v1043_v37 = vadd.f32 %v1042_v53, %v2998_v27  ;;  %v1378_v27 = vld.sshfl [vmem:[#allocation1 + $0x8] sm:$0xff pattern:$0x75316420] }
 0x249   :  { %1208 = vmatpush.msra.mxu2 %v1084_v15  ;;  %1384 = vrot.lane.b32.xlu0 %v1378_v27, %s2026_s25 }
 0x24a   :  { %v1068_v6 = vpop.f32.mrf.mxu3 }
 0x24b   :  { %v1069_v38 = vadd.f32 %v1068_v6, %v1043_v37  ;;  %1209 = vmatpush.msra.mxu2 %v1079_v46  ;;  %v3065_v6 = vpop.permute.xlu1 %1266 }
 0x24d   :  { %v1085_v33 = vmax.f32 %v1069_v38, 0.0  ;;  %1210 = vmatpush.msra.mxu2 %v1074_v31 }
 0x24e   :  { %1634 = vmatmul.msk.f32.vlgmr.msra.gmra.mxu2 %vm1107_vm11, %v3005_v9 }
 0x24f   :  { %1234 = vmatpush.msrb.mxu0 %v1085_v33 }
 0x251   :  { %1235 = vmatpush.msrb.mxu0 %v1080_v21  ;;  %1390 = vrot.lane.b32.xlu0 %v1381_v51, %s2026_s25  ;;  %s2034_s25 = smov 124  }
 0x253   :  { %1236 = vmatpush.msrb.mxu0 %v1075_v56 }
 0x254   :  { %1637 = vmatmul.msk.f32.vlgmr.msrb.gmra.mxu0 %vm1107_vm11, %v3005_v9 }
 0x256   :  { %1635 = vmatmul.msk.f32.gmra.mxu2 %vm1107_vm11, %v3015_v36 }
 0x25c   :  { %1638 = vmatmul.msk.f32.gmra.mxu0 %vm1107_vm11, %v3015_v36  ;;  %v1262_v36 = vld [vmem:[%s3129_s7] sm:$0xf]  ;;  %s2033_s7 = smov 122  }
 0x25e   :  { %1636 = vmatmul.msk.f32.gmra.mxu2 %vm1107_vm11, %v1088_v28 }
 0x264   :  { %1639 = vmatmul.msk.f32.gmra.mxu0 %vm1107_vm11, %v1088_v28 }
 0x26c   :  { %v1383_v11 = vpop.permute.xlu2 %1382 }
 0x284   :  { %v1387_v33 = vpop.permute.xlu1 %1386 }
 0x288   :  { %v1134_v32 = vpop.f32.mrf.mxu0 }
 0x289   :  { %v1135_v5 = vadd.f32 %v1134_v32, %v1095_v54 }
 0x28b   :  { %v1247_v47 = vmax.f32 %v1135_v5, 0.0 }
 0x290   :  { %v1137_v12 = vpop.f32.mrf.mxu0 }
 0x291   :  { %v1138_v9 = vadd.f32 %v1137_v12, %v1100_v26 }
 0x293   :  { %v1252_v59 = vmax.f32 %v1138_v9, 0.0 }
 0x297   :  { %v1160_v1 = vpop.f32.mrf.mxu1 }
 0x298   :  { %v1140_v41 = vpop.f32.mrf.mxu0  ;;  %v1161_v49 = vadd.f32 %v1160_v1, %v1095_v54  ;;  %v1389_v1 = vpop.permute.xlu2 %1388 }
 0x299   :  { %v1141_v42 = vadd.f32 %v1140_v41, %v1105_v44 }
 0x29a   :  { %v1248_v62 = vmax.f32 %v1161_v49, 0.0 }
 0x29b   :  { %v1257_v48 = vmax.f32 %v1141_v42, 0.0 }
 0x29d   :  { %1285 = vmatpush.msrb.mxu1 %v1257_v48 }
 0x29f   :  { %v1163_v14 = vpop.f32.mrf.mxu1  ;;  %1286 = vmatpush.msrb.mxu1 %v1252_v59 }
 0x2a0   :  { %v1164_v17 = vadd.f32 %v1163_v14, %v1100_v26 }
 0x2a1   :  { %1287 = vmatpush.msrb.mxu1 %v1247_v47 }
 0x2a2   :  { %1640 = vmatmul.msk.f32.vlgmr.msrb.gmra.mxu1 %vm1107_vm11, %v1262_v36  ;;  %v1253_v39 = vmax.f32 %v1164_v17, 0.0 }
 0x2a5   :  { %v1186_v18 = vpop.f32.mrf.mxu3 }
 0x2a6   :  { %v1187_v7 = vadd.f32 %v1186_v18, %v1095_v54 }
 0x2a7   :  { %v1166_v8 = vpop.f32.mrf.mxu1 }
 0x2a8   :  { %v1167_v50 = vadd.f32 %v1166_v8, %v1105_v44  ;;  %v1249_v23 = vmax.f32 %v1187_v7, 0.0 }
 0x2aa   :  { %v1258_v55 = vmax.f32 %v1167_v50, 0.0 }
 0x2ac   :  { %1305 = vmatpush.msrb.mxu3 %v1258_v55 }
 0x2ad   :  { %v1189_v40 = vpop.f32.mrf.mxu3 }
 0x2ae   :  { %1306 = vmatpush.msrb.mxu3 %v1253_v39  ;;  %v1190_v61 = vadd.f32 %v1189_v40, %v1100_v26 }
 0x2b0   :  { %1307 = vmatpush.msrb.mxu3 %v1248_v62  ;;  %v1254_v16 = vmax.f32 %v1190_v61, 0.0 }
 0x2b1   :  { %1641 = vmatmul.msk.f32.vlgmr.msrb.gmra.mxu3 %vm1107_vm11, %v1262_v36 }
 0x2b5   :  { %v1192_v25 = vpop.f32.mrf.mxu3 }
 0x2b6   :  { %v1193_v28 = vadd.f32 %v1192_v25, %v1105_v44 }
 0x2b8   :  { %v1259_v60 = vmax.f32 %v1193_v28, 0.0 }
 0x2ba   :  { %1325 = vmatpush.msra.mxu1 %v1259_v60 }
 0x2bb   :  { %v1385_v46 = vpop.permute.xlu0 %1384 }
 0x2bc   :  { %1326 = vmatpush.msra.mxu1 %v1254_v16  ;;  %v1392_v30 = vsel %vm487_vm3, %v1383_v11, %v1385_v46  ;;  %v1393_v56 = vsel %vm487_vm3, %v1385_v46, %v1387_v33 }
 0x2be   :  { %1327 = vmatpush.msra.mxu1 %v1249_v23 }
 0x2bf   :  { %1642 = vmatmul.msk.f32.vlgmr.msra.gmra.mxu1 %vm1107_vm11, %v1262_v36 }
 0x2c3   :  { %v1391_v9 = vpop.permute.xlu0 %1390 }
 0x2c4   :  { %v1395_v5 = vsel %vm487_vm3, %v1389_v1, %v1391_v9 }
 0x2d1   :  { %v1212_v20 = vpop.f32.mrf.mxu2  ;;  %v1238_v52 = vpop.f32.mrf.mxu0 }
 0x2d2   :  { %v1213_v13 = vadd.f32 %v1212_v20, %v1095_v54  ;;  %v1239_v4 = vadd.f32 %v1238_v52, %v1095_v54 }
 0x2d4   :  { %v1250_v53 = vmax.f32 %v1213_v13, 0.0  ;;  %v1251_v37 = vmax.f32 %v1239_v4, 0.0 }
 0x2d9   :  { %v1215_v43 = vpop.f32.mrf.mxu2  ;;  %v1241_v22 = vpop.f32.mrf.mxu0 }
 0x2da   :  { %v1216_v0 = vadd.f32 %v1215_v43, %v1100_v26  ;;  %v1242_v63 = vadd.f32 %v1241_v22, %v1100_v26  ;;  %v1394_v26 = vsel %vm487_vm3, %v1387_v33, %v1389_v1  ;;  %vm1430_vm3 = vcmask 932864  }
 0x2dc   :  { %v1255_v35 = vmax.f32 %v1216_v0, 0.0  ;;  %v1256_v15 = vmax.f32 %v1242_v63, 0.0 }
 0x2e1   :  { %v1218_v58 = vpop.f32.mrf.mxu2  ;;  %v1244_v24 = vpop.f32.mrf.mxu0 }
 0x2e2   :  { %v1219_v19 = vadd.f32 %v1218_v58, %v1105_v44  ;;  %v1245_v10 = vadd.f32 %v1244_v24, %v1105_v44 }
 0x2e4   :  { %v1260_v2 = vmax.f32 %v1219_v19, 0.0  ;;  %v1261_v29 = vmax.f32 %v1245_v10, 0.0 }
 0x2e6   :  { %1345 = vmatpush.msrb.mxu2 %v1260_v2  ;;  %1365 = vmatpush.msra.mxu3 %v1261_v29 }
 0x2e8   :  { %1346 = vmatpush.msrb.mxu2 %v1255_v35  ;;  %1366 = vmatpush.msra.mxu3 %v1256_v15 }
 0x2ea   :  { %1347 = vmatpush.msrb.mxu2 %v1250_v53  ;;  %1367 = vmatpush.msra.mxu3 %v1251_v37 }
 0x2eb   :  { %1643 = vmatmul.msk.f32.vlgmr.msrb.gmra.mxu2 %vm1107_vm11, %v1262_v36  ;;  %1644 = vmatmul.msk.f32.vlgmr.msra.gmra.mxu3 %vm1107_vm11, %v1262_v36 }
 0x31f   :  { %v1289_v31 = vpop.f32.mrf.mxu1 }
 0x320   :  { %v1290_v38 = vadd.f32 %v1289_v31, %v3065_v6 }
 0x322   :  { %v3069_v57 = vadd.f32 %v1392_v30, %v1290_v38 }
 0x324   :  { %1413 = vrot.lane.b32.xlu0 %v3069_v57, %s2033_s7  ;;  %1410 = vrot.lane.b32.xlu2 %v3069_v57, %s2034_s25 }
 0x325   :  { %1407 = vrot.lane.b32.xlu1 %v3069_v57, %s2030_s29  ;;  %s2039_s29 = smov 112  }
 0x32c   :  { %1422 = vrot.lane.b32.xlu0 %v3069_v57, %s2035_s20  ;;  %1419 = vrot.lane.b32.xlu2 %v3069_v57, %s2036_s8  ;;  %s1574_s20 = sshll.u32 %s3131_s9, 4  ;;  %s2062_s8 = smov 128   ;;  %s1575_s20 = int_to_ptr.hbm [resolvable:$true] %s1574_s20 }
 0x32d   :  { %1416 = vrot.lane.b32.xlu1 %v3069_v57, %s2037_s21  ;;  %s2063_s21 = smov 8  }
 0x334   :  { %v1309_v21 = vpop.f32.mrf.mxu3 }
 0x335   :  { %v1310_v32 = vadd.f32 %v1309_v21, %v3065_v6  ;;  %1426 = vrot.lane.b32.xlu1 %v3069_v57, %s2038_s0 }
 0x337   :  { %v1402_v27 = vadd.f32 %v1393_v56, %v1310_v32 }
 0x339   :  { %1433 = vrot.lane.b32.xlu0 %v1402_v27, %s2039_s29  ;;  %1428 = vrot.lane.b32.xlu2 %v1402_v27, %s2038_s0 }
 0x33c   :  { %v1329_v12 = vpop.f32.mrf.mxu1 }
 0x33d   :  { %1436 = vrot.lane.b32.xlu1 %v1402_v27, %s2029_s28  ;;  %v1330_v44 = vadd.f32 %v1329_v12, %v3065_v6  ;;  %s2045_s28 = smov 98  }
 0x33f   :  { %v1403_v41 = vadd.f32 %v1394_v26, %v1330_v44 }
 0x341   :  { %1442 = vrot.lane.b32.xlu0 %v1402_v27, %s2040_s2  ;;  %1439 = vrot.lane.b32.xlu2 %v1402_v27, %s2027_s26  ;;  %s2047_s26 = smov 54  }
 0x345   :  { %1445 = vrot.lane.b32.xlu1 %v1402_v27, %s2041_s22 }
 0x349   :  { %1452 = vrot.lane.b32.xlu0 %v1402_v27, %s2042_s23  ;;  %1448 = vrot.lane.b32.xlu2 %v1402_v27, %s2043_s24 }
 0x34d   :  { %1454 = vrot.lane.b32.xlu1 %v1403_v41, %s2042_s23 }
 0x351   :  { %1489 = vrot.lane.b32.xlu0 %v1403_v41, %s2044_s1  ;;  %1459 = vrot.lane.b32.xlu2 %v1403_v41, %s2045_s28 }
 0x355   :  { %1492 = vrot.lane.b32.xlu1 %v1403_v41, %s2046_s27 }
 0x359   :  { %1499 = vrot.lane.b32.xlu2 %v1403_v41, %s2047_s26 }
 0x35d   :  { %1495 = vrot.lane.b32.xlu1 %v1403_v41, %s2048_s30 }
 0x36e   :  { %v1349_v42 = vpop.f32.mrf.mxu2  ;;  %v1369_v59 = vpop.f32.mrf.mxu3 }
 0x36f   :  { %v1350_v54 = vadd.f32 %v1349_v42, %v3065_v6  ;;  %v1370_v14 = vadd.f32 %v1369_v59, %v3065_v6 }
 0x371   :  { %v1404_v48 = vadd.f32 %v1395_v5, %v1350_v54  ;;  %v1405_v45 = vadd.f32 %v1391_v9, %v1370_v14 }
 0x373   :  { %1521 = vrot.lane.b32.xlu0 %v1404_v48, %s2049_s10  ;;  %1518 = vrot.lane.b32.xlu2 %v1404_v48, %s2050_s11 }
 0x374   :  { %1525 = vrot.lane.b32.xlu1 %v1404_v48, %s2051_s3 }
 0x37b   :  { %1501 = vrot.lane.b32.xlu0 %v1404_v48, %s2047_s26  ;;  %1509 = vrot.lane.b32.xlu2 %v1404_v48, %s2052_s12 }
 0x37c   :  { %1535 = vrot.lane.b32.xlu1 %v1405_v45, %s2053_s4 }
 0x37e   :  { %v1411_v3 = vpop.permute.xlu2 %1410 }
 0x383   :  { %1506 = vrot.lane.b32.xlu0 %v1404_v48, %s2054_s13  ;;  %1527 = vrot.lane.b32.xlu2 %v1405_v45, %s2051_s3 }
 0x384   :  { %1541 = vrot.lane.b32.xlu1 %v1405_v45, %s2055_s6 }
 0x386   :  { %v1420_v18 = vpop.permute.xlu2 %1419 }
 0x38b   :  { %1532 = vrot.lane.b32.xlu0 %v1405_v45, %s2056_s14  ;;  %1538 = vrot.lane.b32.xlu2 %v1405_v45, %s2057_s15 }
 0x38c   :  { %1512 = vrot.lane.b32.xlu1 %v1404_v48, %s2058_s16 }
 0x393   :  { %1544 = vrot.lane.b32.xlu0 %v1405_v45, %s2059_s17  ;;  %1515 = vrot.lane.b32.xlu2 %v1404_v48, %s2060_s18  ;;  %v1429_v17 = vpop.permute.xlu2 %1428 }
 0x396   :  { %v1414_v36 = vpop.permute.xlu0 %1413 }
 0x397   :  { %v1408_v47 = vpop.permute.xlu1 %1407 }
 0x398   :  { %v1463_v25 = vsel %vm1462_vm12, %v3069_v57, %v1408_v47 }
 0x399   :  { %v1465_v60 = vsel %vm1464_vm13, %v1463_v25, %v1411_v3 }
 0x39a   :  { %v1467_v23 = vsel %vm1466_vm14, %v1465_v60, %v1414_v36 }
 0x39b   :  { %v1440_v39 = vpop.permute.xlu2 %1439 }
 0x39e   :  { %v1423_v50 = vpop.permute.xlu0 %1422 }
 0x39f   :  { %v1417_v8 = vpop.permute.xlu1 %1416 }
 0x3a0   :  { %v1469_v51 = vsel %vm1468_vm15, %v1467_v23, %v1417_v8 }
 0x3a1   :  { %v1471_v22 = vsel %vm1470_vm1, %v1469_v51, %v1420_v18 }
 0x3a2   :  { %v1473_v13 = vsel %vm1472_vm4, %v1471_v22, %v1423_v50 }
 0x3a3   :  { %v1449_v61 = vpop.permute.xlu2 %1448 }
 0x3a7   :  { %v1427_v49 = vpop.permute.xlu1 %1426 }
 0x3a8   :  { %v1431_v0 = vsel %vm1430_vm3, %v1427_v49, %v1429_v17 }
 0x3a9   :  { %v1475_v2 = vsel %vm1474_vm5, %v1473_v13, %v1431_v0 }
 0x3ab   :  { %v1434_v55 = vpop.permute.xlu0 %1433  ;;  %v1460_v63 = vpop.permute.xlu2 %1459 }
 0x3af   :  { %v1437_v40 = vpop.permute.xlu1 %1436 }
 0x3b0   :  { %v1476_v7 = vsel %vm1462_vm12, %v1434_v55, %v1437_v40 }
 0x3b1   :  { %v1477_v16 = vsel %vm1464_vm13, %v1476_v7, %v1440_v39 }
 0x3b3   :  { %v1443_v62 = vpop.permute.xlu0 %1442  ;;  %v1500_v15 = vpop.permute.xlu2 %1499 }
 0x3b4   :  { %v1478_v34 = vsel %vm1466_vm14, %v1477_v16, %v1443_v62 }
 0x3b7   :  { %v1446_v28 = vpop.permute.xlu1 %1445 }
 0x3b8   :  { %v1479_v20 = vsel %vm1468_vm15, %v1478_v34, %v1446_v28 }
 0x3b9   :  { %v1480_v58 = vsel %vm1470_vm1, %v1479_v20, %v1449_v61 }
 0x3bb   :  { %v1453_v52 = vpop.permute.xlu0 %1452 }
 0x3bf   :  { %v1455_v43 = vpop.permute.xlu1 %1454 }
 0x3c0   :  { %v1457_v24 = vsel %vm1456_vm2, %v1453_v52, %v1455_v43 }
 0x3c1   :  { %v1481_v19 = vsel %vm1472_vm4, %v1480_v58, %v1457_v24 }
 0x3c2   :  { %v1482_v10 = vsel %vm1474_vm5, %v1481_v19, %v1460_v63 }
 0x3c3   :  { %v1485_v4 = vrot.slane %v1482_v10, 4  ;;  %v1490_v53 = vpop.permute.xlu0 %1489 }
 0x3c5   :  { %v1486_v29 = vsel %vm81_vm0, %v1475_v2, %v1485_v4 }
 0x3c6   :  { %1488 = vst [vmem:[#allocation2] sm:$0xff] %v1486_v29 }
 0x3c7   :  { %v1493_v35 = vpop.permute.xlu1 %1492 }
 0x3c8   :  { %v1547_v26 = vsel %vm1462_vm12, %v1490_v53, %v1493_v35 }
 0x3cd   :  { %v1519_v11 = vpop.permute.xlu2 %1518 }
 0x3cf   :  { %v1496_v37 = vpop.permute.xlu1 %1495 }
 0x3d0   :  { %v1548_v9 = vsel %vm1464_vm13, %v1547_v26, %v1496_v37 }
 0x3d5   :  { %v1510_v31 = vpop.permute.xlu2 %1509 }
 0x3dd   :  { %v1528_v57 = vpop.permute.xlu2 %1527 }
 0x3e5   :  { %v1522_v46 = vpop.permute.xlu0 %1521  ;;  %v1539_v27 = vpop.permute.xlu2 %1538 }
 0x3e6   :  { %v1526_v6 = vpop.permute.xlu1 %1525  ;;  %v1554_v56 = vsel %vm1462_vm12, %v1519_v11, %v1522_v46 }
 0x3e7   :  { %v1530_v32 = vsel %vm1529_vm6, %v1526_v6, %v1528_v57 }
 0x3e8   :  { %v1555_v44 = vsel %vm1464_vm13, %v1554_v56, %v1530_v32 }
 0x3ed   :  { %v1502_v30 = vpop.permute.xlu0 %1501  ;;  %v1516_v18 = vpop.permute.xlu2 %1515 }
 0x3ee   :  { %v1536_v38 = vpop.permute.xlu1 %1535  ;;  %v1504_v12 = vsel %vm1503_vm7, %v1500_v15, %v1502_v30 }
 0x3ef   :  { %v1549_v54 = vsel %vm1466_vm14, %v1548_v9, %v1504_v12 }
 0x3f5   :  { %v1507_v33 = vpop.permute.xlu0 %1506 }
 0x3f6   :  { %v1542_v21 = vpop.permute.xlu1 %1541  ;;  %v1550_v5 = vsel %vm1468_vm15, %v1549_v54, %v1507_v33 }
 0x3f7   :  { %v1551_v14 = vsel %vm1470_vm1, %v1550_v5, %v1510_v31 }
 0x3fd   :  { %v1533_v1 = vpop.permute.xlu0 %1532 }
 0x3fe   :  { %v1556_v41 = vsel %vm1466_vm14, %v1555_v44, %v1533_v1  ;;  %v1513_v48 = vpop.permute.xlu1 %1512 }
 0x3ff   :  { %v1557_v42 = vsel %vm1468_vm15, %v1556_v41, %v1536_v38  ;;  %v1552_v45 = vsel %vm1472_vm4, %v1551_v14, %v1513_v48 }
 0x400   :  { %v1558_v59 = vsel %vm1470_vm1, %v1557_v42, %v1539_v27  ;;  %v1553_v17 = vsel %vm1474_vm5, %v1552_v45, %v1516_v18 }
 0x401   :  { %v1559_v47 = vsel %vm1472_vm4, %v1558_v59, %v1542_v21 }
 0x405   :  { %v1545_v3 = vpop.permute.xlu0 %1544 }
 0x406   :  { %v1560_v36 = vsel %vm1474_vm5, %v1559_v47, %v1545_v3 }
 0x407   :  { %v1563_v8 = vrot.slane %v1560_v36, 4 }
 0x409   :  { %v1564_v50 = vsel %vm81_vm0, %v1553_v17, %v1563_v8 }
 0x40a   :  { %1567 = vst [vmem:[#allocation2 + $0x8] sm:$0xff] %v1564_v50 }
 0x40b   :  { %1580 = dma.vmem_to_hbm [thread:$0]  %s1573_s19, 256, %s1575_s20, [#allocation3], %s2062_s8, %s2062_s8, %s2063_s21  }
 0x40c   :  { %2022 = dma.done.wait [#allocation3], 256  }
 0x40d   :  { %2023 = vsyncadd [#allocation3], 4294967040 }
 0x40e   :  { %1585 = vsyncpa [#allocation3], 1 }

</bundles_post_ra>
